<compile_context>
chip_gen: v5e
topology: v5e:2x2
jax: 0.10.0
libtpu: 0.0.40
codegen_flags: <defaults>
</compile_context>

<pallas_src>
import functools

import jax
import jax.numpy as jnp
from jax.experimental import pallas as pl
from jax.experimental.pallas import tpu as pltpu


D_IN = 28 * 28          # 784
HIDDEN = 64
HIDDEN_PAD = 128        # zero-pad hidden width to full lane width
N_CLASSES = 10
CLASS_PAD = 128         # zero-pad class dim to full lane width
NEG_INF_BIAS = -1e30    # neutralizes padded class columns inside log_softmax


def mlp_logsoftmax_kernel(x_ref,
                          w1_ref, b1_ref,
                          w2_ref, b2_ref,
                          w3_ref, b3_ref,
                          w4_ref, b4_ref,
                          o_ref):
    """Fused 4-layer MLP + log_softmax for one (batch_tile, 784) tile.

    Matmuls run on the MXU with bf16 operands / f32 accumulation; bias add,
    ReLU and the log_softmax (max / exp / log reduces over the 128-lane axis)
    stay in f32 on the VPU / EUP / XLU.
    """
    x = x_ref[...]                                    # bf16 (bt, 784)

    h = jnp.dot(x, w1_ref[...], preferred_element_type=jnp.float32) + b1_ref[...]
    h = jnp.maximum(h, 0.0).astype(jnp.bfloat16)

    h = jnp.dot(h, w2_ref[...], preferred_element_type=jnp.float32) + b2_ref[...]
    h = jnp.maximum(h, 0.0).astype(jnp.bfloat16)

    h = jnp.dot(h, w3_ref[...], preferred_element_type=jnp.float32) + b3_ref[...]
    h = jnp.maximum(h, 0.0).astype(jnp.bfloat16)

    logits = jnp.dot(h, w4_ref[...], preferred_element_type=jnp.float32) + b4_ref[...]
    # Padded class columns carry a -1e30 bias: they never win the max and
    # contribute exp(...) == 0 to the denominator, so log_softmax over the
    # first 10 columns is exact.

    m = jnp.max(logits, axis=-1, keepdims=True)
    shifted = logits - m
    lse = jnp.log(jnp.sum(jnp.exp(shifted), axis=-1, keepdims=True))
    o_ref[...] = (shifted - lse).astype(o_ref.dtype)


@functools.partial(jax.jit, static_argnames=("batch_tile",))
def _mlp_forward_padded(x_pad, params, batch_tile):
    """x_pad: (Bp, 784) bf16 with Bp % batch_tile == 0. Returns (Bp, 128) f32."""
    w1, b1, w2, b2, w3, b3, w4, b4 = params
    Bp, d_in = x_pad.shape
    grid = (Bp // batch_tile,)

    def full_spec(shape):
        # Weights / biases: same full-extent block at every grid step.
        return pl.BlockSpec(shape, lambda i: (0, 0))

    return pl.pallas_call(
        mlp_logsoftmax_kernel,
        out_shape=jax.ShapeDtypeStruct((Bp, CLASS_PAD), jnp.float32),
        grid_spec=pltpu.PrefetchScalarGridSpec(
            num_scalar_prefetch=0,
            grid=grid,
            in_specs=[
                pl.BlockSpec((batch_tile, d_in), lambda i: (i, 0)),
                full_spec(w1.shape), full_spec(b1.shape),
                full_spec(w2.shape), full_spec(b2.shape),
                full_spec(w3.shape), full_spec(b3.shape),
                full_spec(w4.shape), full_spec(b4.shape),
            ],
            out_specs=pl.BlockSpec((batch_tile, CLASS_PAD), lambda i: (i, 0)),
        ),
        compiler_params=pltpu.CompilerParams(
            dimension_semantics=("parallel",),       # megacore-shard batch tiles
            vmem_limit_bytes=32 * 1024 * 1024,       # portable to v7x (64 MiB phys)
        ),
    )(x_pad, w1, b1, w2, b2, w3, b3, w4, b4)


def mlp_forward(x, params, batch_tile=256):
    """x: (B, 784). Returns (B, 10) float32 log-probabilities."""
    B = x.shape[0]
    Bp = ((B + batch_tile - 1) // batch_tile) * batch_tile
    x = x.astype(jnp.bfloat16)
    if Bp != B:
        x = jnp.pad(x, ((0, Bp - B), (0, 0)))
    out = _mlp_forward_padded(x, params, batch_tile)
    return out[:B, :N_CLASSES]


def init_linear(key, fan_in, fan_out):
    # Matches torch.nn.Linear default init: U(-1/sqrt(fan_in), 1/sqrt(fan_in)).
    kw, kb = jax.random.split(key)
    bound = 1.0 / jnp.sqrt(jnp.float32(fan_in))
    w = jax.random.uniform(kw, (fan_in, fan_out), jnp.float32, -bound, bound)
    b = jax.random.uniform(kb, (1, fan_out), jnp.float32, -bound, bound)
    return w, b


def prepare_params(params_f32):
    """Pad hidden dims 64->128 and classes 10->128; cast weights to bf16.

    Zero padding is numerically exact through the ReLU layers; padded class
    columns get a -1e30 bias so they are neutral in the log_softmax.
    """
    w1, b1, w2, b2, w3, b3, w4, b4 = params_f32

    def pad_w(w, rows, cols):
        return jnp.pad(w, ((0, rows - w.shape[0]), (0, cols - w.shape[1])))

    def pad_b(b, cols, fill=0.0):
        return jnp.pad(b, ((0, 0), (0, cols - b.shape[1])), constant_values=fill)

    w1p = pad_w(w1, D_IN, HIDDEN_PAD).astype(jnp.bfloat16)
    w2p = pad_w(w2, HIDDEN_PAD, HIDDEN_PAD).astype(jnp.bfloat16)
    w3p = pad_w(w3, HIDDEN_PAD, HIDDEN_PAD).astype(jnp.bfloat16)
    w4p = pad_w(w4, HIDDEN_PAD, CLASS_PAD).astype(jnp.bfloat16)
    b1p = pad_b(b1, HIDDEN_PAD)                      # biases stay f32
    b2p = pad_b(b2, HIDDEN_PAD)
    b3p = pad_b(b3, HIDDEN_PAD)
    b4p = pad_b(b4, CLASS_PAD, fill=NEG_INF_BIAS)
    return (w1p, b1p, w2p, b2p, w3p, b3p, w4p, b4p)


def reference_forward(x, params_f32):
    w1, b1, w2, b2, w3, b3, w4, b4 = params_f32
    h = jax.nn.relu(x @ w1 + b1)
    h = jax.nn.relu(h @ w2 + b2)
    h = jax.nn.relu(h @ w3 + b3)
    logits = h @ w4 + b4
    return jax.nn.log_softmax(logits, axis=1)


if __name__ == "__main__":
    key = jax.random.PRNGKey(0)
    k_x, k1, k2, k3, k4 = jax.random.split(key, 5)

    B = 8  # small demo batch; wrapper pads to one 256-row tile
    x = jax.random.normal(k_x, (B, D_IN), dtype=jnp.float32)

    w1, b1 = init_linear(k1, D_IN, HIDDEN)
    w2, b2 = init_linear(k2, HIDDEN, HIDDEN)
    w3, b3 = init_linear(k3, HIDDEN, HIDDEN)
    w4, b4 = init_linear(k4, HIDDEN, N_CLASSES)
    params_f32 = (w1, b1, w2, b2, w3, b3, w4, b4)
    params = prepare_params(params_f32)

    out = mlp_forward(x, params, batch_tile=256)
    out = jax.block_until_ready(out)

    ref = reference_forward(x, params_f32)
    assert out.shape == (B, N_CLASSES)
    # bf16 weights/activations (f32 accumulation) vs. pure-f32 reference:
    # loosened tolerance.
    max_err = float(jnp.max(jnp.abs(out - ref)))
    assert jnp.allclose(out, ref, atol=1e-1, rtol=0.0), max_err

    print("KERNEL_OK")
</pallas_src>

<mosaic_0001>
module attributes {stable_mosaic.version = 11 : i64} {
  func.func @mlp_logsoftmax_kernel(%arg0: i32, %arg1: memref<256x784xbf16, #tpu.memory_space<vmem>>, %arg2: memref<784x128xbf16, #tpu.memory_space<vmem>>, %arg3: memref<1x128xf32, #tpu.memory_space<vmem>>, %arg4: memref<128x128xbf16, #tpu.memory_space<vmem>>, %arg5: memref<1x128xf32, #tpu.memory_space<vmem>>, %arg6: memref<128x128xbf16, #tpu.memory_space<vmem>>, %arg7: memref<1x128xf32, #tpu.memory_space<vmem>>, %arg8: memref<128x128xbf16, #tpu.memory_space<vmem>>, %arg9: memref<1x128xf32, #tpu.memory_space<vmem>>, %arg10: memref<256x128xf32, #tpu.memory_space<vmem>>) attributes {dimension_semantics = [#tpu.dimension_semantics<parallel>], iteration_bounds = array<i64: 1>, scalar_prefetch = 0 : i64, scratch_operands = 0 : i64, tpu.core_type = #tpu.core_type<tc>, window_params = [{transform_indices = @transform_0, window_bounds = array<i64: 256, 784>}, {pipeline_mode = #tpu.pipeline_mode<synchronous>, transform_indices = @transform_1, window_bounds = array<i64: 784, 128>}, {pipeline_mode = #tpu.pipeline_mode<synchronous>, transform_indices = @transform_2, window_bounds = array<i64: 1, 128>}, {pipeline_mode = #tpu.pipeline_mode<synchronous>, transform_indices = @transform_3, window_bounds = array<i64: 128, 128>}, {pipeline_mode = #tpu.pipeline_mode<synchronous>, transform_indices = @transform_4, window_bounds = array<i64: 1, 128>}, {pipeline_mode = #tpu.pipeline_mode<synchronous>, transform_indices = @transform_5, window_bounds = array<i64: 128, 128>}, {pipeline_mode = #tpu.pipeline_mode<synchronous>, transform_indices = @transform_6, window_bounds = array<i64: 1, 128>}, {pipeline_mode = #tpu.pipeline_mode<synchronous>, transform_indices = @transform_7, window_bounds = array<i64: 128, 128>}, {pipeline_mode = #tpu.pipeline_mode<synchronous>, transform_indices = @transform_8, window_bounds = array<i64: 1, 128>}, {transform_indices = @transform_9, window_bounds = array<i64: 256, 128>}]} {
    %c0 = arith.constant 0 : index
    %c0_0 = arith.constant 0 : index
    %0 = vector.load %arg1[%c0, %c0_0] : memref<256x784xbf16, #tpu.memory_space<vmem>>, vector<256x784xbf16>
    %c0_1 = arith.constant 0 : index
    %c0_2 = arith.constant 0 : index
    %1 = vector.load %arg2[%c0_1, %c0_2] : memref<784x128xbf16, #tpu.memory_space<vmem>>, vector<784x128xbf16>
    %cst = arith.constant dense<0.000000e+00> : vector<256x128xf32>
    %2 = tpu.matmul %0, %1, %cst {dimension_numbers = #tpu.dot_dimension_numbers<[1], [0], [0], [1], [0, 0, 1, 1], [], []>} : vector<256x784xbf16>, vector<784x128xbf16>, vector<256x128xf32> -> vector<256x128xf32>
    %c0_3 = arith.constant 0 : index
    %c0_4 = arith.constant 0 : index
    %3 = vector.load %arg3[%c0_3, %c0_4] : memref<1x128xf32, #tpu.memory_space<vmem>>, vector<1x128xf32>
    %4 = vector.broadcast %3 : vector<1x128xf32> to vector<256x128xf32>
    %5 = arith.addf %2, %4 : vector<256x128xf32>
    %cst_5 = arith.constant 0.000000e+00 : f32
    %6 = vector.broadcast %cst_5 : f32 to vector<256x128xf32>
    %7 = arith.maximumf %5, %6 : vector<256x128xf32>
    %8 = arith.truncf %7 : vector<256x128xf32> to vector<256x128xbf16>
    %c0_6 = arith.constant 0 : index
    %c0_7 = arith.constant 0 : index
    %9 = vector.load %arg4[%c0_6, %c0_7] : memref<128x128xbf16, #tpu.memory_space<vmem>>, vector<128x128xbf16>
    %cst_8 = arith.constant dense<0.000000e+00> : vector<256x128xf32>
    %10 = tpu.matmul %8, %9, %cst_8 {dimension_numbers = #tpu.dot_dimension_numbers<[1], [0], [0], [1], [0, 0, 1, 1], [], []>} : vector<256x128xbf16>, vector<128x128xbf16>, vector<256x128xf32> -> vector<256x128xf32>
    %c0_9 = arith.constant 0 : index
    %c0_10 = arith.constant 0 : index
    %11 = vector.load %arg5[%c0_9, %c0_10] : memref<1x128xf32, #tpu.memory_space<vmem>>, vector<1x128xf32>
    %12 = vector.broadcast %11 : vector<1x128xf32> to vector<256x128xf32>
    %13 = arith.addf %10, %12 : vector<256x128xf32>
    %cst_11 = arith.constant 0.000000e+00 : f32
    %14 = vector.broadcast %cst_11 : f32 to vector<256x128xf32>
    %15 = arith.maximumf %13, %14 : vector<256x128xf32>
    %16 = arith.truncf %15 : vector<256x128xf32> to vector<256x128xbf16>
    %c0_12 = arith.constant 0 : index
    %c0_13 = arith.constant 0 : index
    %17 = vector.load %arg6[%c0_12, %c0_13] : memref<128x128xbf16, #tpu.memory_space<vmem>>, vector<128x128xbf16>
    %cst_14 = arith.constant dense<0.000000e+00> : vector<256x128xf32>
    %18 = tpu.matmul %16, %17, %cst_14 {dimension_numbers = #tpu.dot_dimension_numbers<[1], [0], [0], [1], [0, 0, 1, 1], [], []>} : vector<256x128xbf16>, vector<128x128xbf16>, vector<256x128xf32> -> vector<256x128xf32>
    %c0_15 = arith.constant 0 : index
    %c0_16 = arith.constant 0 : index
    %19 = vector.load %arg7[%c0_15, %c0_16] : memref<1x128xf32, #tpu.memory_space<vmem>>, vector<1x128xf32>
    %20 = vector.broadcast %19 : vector<1x128xf32> to vector<256x128xf32>
    %21 = arith.addf %18, %20 : vector<256x128xf32>
    %cst_17 = arith.constant 0.000000e+00 : f32
    %22 = vector.broadcast %cst_17 : f32 to vector<256x128xf32>
    %23 = arith.maximumf %21, %22 : vector<256x128xf32>
    %24 = arith.truncf %23 : vector<256x128xf32> to vector<256x128xbf16>
    %c0_18 = arith.constant 0 : index
    %c0_19 = arith.constant 0 : index
    %25 = vector.load %arg8[%c0_18, %c0_19] : memref<128x128xbf16, #tpu.memory_space<vmem>>, vector<128x128xbf16>
    %cst_20 = arith.constant dense<0.000000e+00> : vector<256x128xf32>
    %26 = tpu.matmul %24, %25, %cst_20 {dimension_numbers = #tpu.dot_dimension_numbers<[1], [0], [0], [1], [0, 0, 1, 1], [], []>} : vector<256x128xbf16>, vector<128x128xbf16>, vector<256x128xf32> -> vector<256x128xf32>
    %c0_21 = arith.constant 0 : index
    %c0_22 = arith.constant 0 : index
    %27 = vector.load %arg9[%c0_21, %c0_22] : memref<1x128xf32, #tpu.memory_space<vmem>>, vector<1x128xf32>
    %28 = vector.broadcast %27 : vector<1x128xf32> to vector<256x128xf32>
    %29 = arith.addf %26, %28 : vector<256x128xf32>
    %cst_23 = arith.constant dense<0xFF800000> : vector<256xf32>
    %30 = vector.multi_reduction <maximumf>, %29, %cst_23 [1] : vector<256x128xf32> to vector<256xf32>
    %31 = vector.shape_cast %30 : vector<256xf32> to vector<256x1xf32>
    %32 = vector.broadcast %31 : vector<256x1xf32> to vector<256x128xf32>
    %33 = arith.subf %29, %32 : vector<256x128xf32>
    %34 = math.exp %33 : vector<256x128xf32>
    %cst_24 = arith.constant dense<0.000000e+00> : vector<256xf32>
    %35 = vector.multi_reduction <add>, %34, %cst_24 [1] : vector<256x128xf32> to vector<256xf32>
    %36 = vector.shape_cast %35 : vector<256xf32> to vector<256x1xf32>
    %37 = math.log %36 : vector<256x1xf32>
    %38 = vector.broadcast %37 : vector<256x1xf32> to vector<256x128xf32>
    %39 = arith.subf %33, %38 : vector<256x128xf32>
    %c0_25 = arith.constant 0 : index
    %c0_26 = arith.constant 0 : index
    %40 = vector.load %arg10[%c0_25, %c0_26] : memref<256x128xf32, #tpu.memory_space<vmem>>, vector<256x128xf32>
    tpu.vector_store %arg10[%c0_25, %c0_26], %39 {strides = array<i32>} : memref<256x128xf32, #tpu.memory_space<vmem>>, vector<256x128xf32>,
    return
  }
  func.func @transform_0(%arg0: i32) -> (i32, i32) {
    %c0_i32 = arith.constant 0 : i32
    %c0_i32_0 = arith.constant 0 : i32
    return %arg0, %c0_i32 : i32, i32
  }
  func.func @transform_1(%arg0: i32) -> (i32, i32) {
    %c0_i32 = arith.constant 0 : i32
    %c0_i32_0 = arith.constant 0 : i32
    %c0_i32_1 = arith.constant 0 : i32
    return %c0_i32, %c0_i32_0 : i32, i32
  }
  func.func @transform_2(%arg0: i32) -> (i32, i32) {
    %c0_i32 = arith.constant 0 : i32
    %c0_i32_0 = arith.constant 0 : i32
    %c0_i32_1 = arith.constant 0 : i32
    return %c0_i32, %c0_i32_0 : i32, i32
  }
  func.func @transform_3(%arg0: i32) -> (i32, i32) {
    %c0_i32 = arith.constant 0 : i32
    %c0_i32_0 = arith.constant 0 : i32
    %c0_i32_1 = arith.constant 0 : i32
    return %c0_i32, %c0_i32_0 : i32, i32
  }
  func.func @transform_4(%arg0: i32) -> (i32, i32) {
    %c0_i32 = arith.constant 0 : i32
    %c0_i32_0 = arith.constant 0 : i32
    %c0_i32_1 = arith.constant 0 : i32
    return %c0_i32, %c0_i32_0 : i32, i32
  }
  func.func @transform_5(%arg0: i32) -> (i32, i32) {
    %c0_i32 = arith.constant 0 : i32
    %c0_i32_0 = arith.constant 0 : i32
    %c0_i32_1 = arith.constant 0 : i32
    return %c0_i32, %c0_i32_0 : i32, i32
  }
  func.func @transform_6(%arg0: i32) -> (i32, i32) {
    %c0_i32 = arith.constant 0 : i32
    %c0_i32_0 = arith.constant 0 : i32
    %c0_i32_1 = arith.constant 0 : i32
    return %c0_i32, %c0_i32_0 : i32, i32
  }
  func.func @transform_7(%arg0: i32) -> (i32, i32) {
    %c0_i32 = arith.constant 0 : i32
    %c0_i32_0 = arith.constant 0 : i32
    %c0_i32_1 = arith.constant 0 : i32
    return %c0_i32, %c0_i32_0 : i32, i32
  }
  func.func @transform_8(%arg0: i32) -> (i32, i32) {
    %c0_i32 = arith.constant 0 : i32
    %c0_i32_0 = arith.constant 0 : i32
    %c0_i32_1 = arith.constant 0 : i32
    return %c0_i32, %c0_i32_0 : i32, i32
  }
  func.func @transform_9(%arg0: i32) -> (i32, i32) {
    %c0_i32 = arith.constant 0 : i32
    %c0_i32_0 = arith.constant 0 : i32
    return %arg0, %c0_i32 : i32, i32
  }
}

</mosaic_0001>

<bundles_post_ra>
// kernel: _mlp_forward_padded.1
= control target key start
LH: loop header
LB: loop body
LE: loop exit
PB: predicated region body
PF: predicated region fallthrough
CT: control target
= control target key end

     0   :  { %s5500_s0 = inlined_call_operand.vmem [shape: bf16[256,784], index: 0, kind: input, shape index: {}]   ;;  %s5501_s1 = inlined_call_operand.vmem [shape: bf16[784,128], index: 1, kind: input, shape index: {}]   ;;  %s5502_s2 = inlined_call_operand.vmem [shape: f32[1,128], index: 2, kind: input, shape index: {}]   ;;  %s5503_s3 = inlined_call_operand.vmem [shape: bf16[128,128], index: 3, kind: input, shape index: {}]   ;;  %s5504_s4 = inlined_call_operand.vmem [shape: f32[1,128], index: 4, kind: input, shape index: {}]   ;;  %s5505_s5 = inlined_call_operand.vmem [shape: bf16[128,128], index: 5, kind: input, shape index: {}]   ;;  %s5506_s6 = inlined_call_operand.vmem [shape: f32[1,128], index: 6, kind: input, shape index: {}]   ;;  %s5507_s7 = inlined_call_operand.vmem [shape: bf16[128,128], index: 7, kind: input, shape index: {}]   ;;  %s5508_s8 = inlined_call_operand.vmem [shape: f32[1,128], index: 8, kind: input, shape index: {}]   ;;  %s5509_s9 = inlined_call_operand.hbm [shape: f32[256,128], index: 9, kind: output, shape index: {}]  }
   0x1   :  { %v3650_v0 = vld [vmem:[%s5501_s1 + $0x38] sm:$0xff]  ;;  %v3649_v2 = vld [vmem:[%s5501_s1 + $0x30] sm:$0xff]  ;;  %v3648_v4 = vld [vmem:[%s5501_s1 + $0x28] sm:$0xff] }
   0x2   :  { %v3658_v1 = vld [vmem:[%s5501_s1 + $0x78] sm:$0xff]  ;;  %3716 = vmatpush.bf16.msra.mxu2 %v3650_v0  ;;  %v3657_v3 = vld [vmem:[%s5501_s1 + $0x70] sm:$0xff]  ;;  %1167 = vmatpush.bf16.msra.mxu0 %v3650_v0  ;;  %v3656_v5 = vld [vmem:[%s5501_s1 + $0x68] sm:$0xff] }
   0x3   :  { %3724 = vmatpush.bf16.msra.mxu3 %v3658_v1  ;;  %1256 = vmatpush.bf16.msra.mxu1 %v3658_v1  ;;  %v3647_v6 = vld [vmem:[%s5501_s1 + $0x20] sm:$0xff] }
   0x4   :  { %v3655_v7 = vld [vmem:[%s5501_s1 + $0x60] sm:$0xff] }
   0x6   :  { %3717 = vmatpush.bf16.msra.mxu2 %v3649_v2  ;;  %1168 = vmatpush.bf16.msra.mxu0 %v3649_v2 }
   0x7   :  { %3725 = vmatpush.bf16.msra.mxu3 %v3657_v3  ;;  %1257 = vmatpush.bf16.msra.mxu1 %v3657_v3 }
   0xa   :  { %3718 = vmatpush.bf16.msra.mxu2 %v3648_v4 }
   0xb   :  { %3726 = vmatpush.bf16.msra.mxu3 %v3656_v5 }
   0xc   :  { %14 = vsyncpa [#allocation3], 0  ;;  %1169 = vmatpush.bf16.msra.mxu0 %v3648_v4  ;;  %1258 = vmatpush.bf16.msra.mxu1 %v3656_v5  ;;  %v3646_v8 = vld [vmem:[%s5501_s1 + $0x18] sm:$0xff]  ;;  %v3645_v10 = vld [vmem:[%s5501_s1 + $0x10] sm:$0xff]  ;;  %vm1118_vm0 = vcmask 130048   ;;  %s2763_s27 = sshll.u32 %s5509_s9, 4  ;;  %s2764_s27 = int_to_ptr.hbm [resolvable:$true] %s2763_s27 }
   0xd   :  { %v3654_v9 = vld [vmem:[%s5501_s1 + $0x58] sm:$0xff]  ;;  %v3653_v11 = vld [vmem:[%s5501_s1 + $0x50] sm:$0xff]  ;;  %v3644_v12 = vld [vmem:[%s5501_s1 + $0x8] sm:$0xff]  ;;  %s3894_s28 = smov 128   ;;  %s3895_s29 = smov 8  }
   0xe   :  { %3719 = vmatpush.bf16.msra.mxu2 %v3647_v6  ;;  %v3652_v13 = vld [vmem:[%s5501_s1 + $0x48] sm:$0xff]  ;;  %v3643_v14 = vld [vmem:[%s5501_s1] sm:$0xff]  ;;  %v3590_v17 = vld [vmem:[%s5500_s0 + $0x1d8] sm:$0xf0] }
   0xf   :  { %3727 = vmatpush.bf16.msra.mxu3 %v3655_v7  ;;  %v3651_v15 = vld [vmem:[%s5501_s1 + $0x40] sm:$0xff]  ;;  %v3666_v20 = vld [vmem:[%s5501_s1 + $0xb8] sm:$0xff]  ;;  %v3665_v29 = vld [vmem:[%s5501_s1 + $0xb0] sm:$0xff] }
  0x10   :  { %1170 = vmatpush.bf16.msra.mxu0 %v3647_v6  ;;  %1259 = vmatpush.bf16.msra.mxu1 %v3655_v7  ;;  %v3001_v16 = vld [vmem:[%s5500_s0 + $0x1c0] sm:$0xf]  ;;  %v3587_v18 = vld [vmem:[%s5500_s0 + $0x1c4] sm:$0xf]  ;;  %v3534_v22 = vld [vmem:[%s5500_s0 + $0x18] sm:$0xf0] }
  0x11   :  { %v3003_v19 = vld [vmem:[%s5500_s0 + $0x1dc] sm:$0xf0]  ;;  %v3531_v23 = vld [vmem:[%s5500_s0 + $0x4] sm:$0xf]  ;;  %v3002_v25 = vor.u32 %v3590_v17, %v3001_v16  ;;  %v3664_v30 = vld [vmem:[%s5501_s1 + $0xa8] sm:$0xff] }
  0x12   :  { %3720 = vmatpush.bf16.msra.mxu2 %v3646_v8  ;;  %v2777_v21 = vld [vmem:[%s5500_s0] sm:$0xf]  ;;  %v3006_v26 = vor.u32 %v3587_v18, %v3003_v19  ;;  %v3029_v31 = vld [vmem:[%s5500_s0 + $0x1f8] sm:$0xf]  ;;  %v3597_v32 = vld [vmem:[%s5500_s0 + $0x210] sm:$0xf0] }
  0x13   :  { %3728 = vmatpush.bf16.msra.mxu3 %v3654_v9  ;;  %v2779_v24 = vld [vmem:[%s5500_s0 + $0x1c] sm:$0xf0]  ;;  %v2778_v27 = vor.u32 %v3534_v22, %v2777_v21  ;;  %v3594_v33 = vld [vmem:[%s5500_s0 + $0x1fc] sm:$0xf]  ;;  %v3031_v34 = vld [vmem:[%s5500_s0 + $0x214] sm:$0xf0]  ;;  %v3030_v39 = vor.u32 %v3597_v32, %v3029_v31 }
  0x14   :  { %1171 = vmatpush.bf16.msra.mxu0 %v3646_v8  ;;  %1260 = vmatpush.bf16.msra.mxu1 %v3654_v9  ;;  %v2782_v28 = vor.u32 %v3531_v23, %v2779_v24  ;;  %v2805_v35 = vld [vmem:[%s5500_s0 + $0x38] sm:$0xf]  ;;  %v3541_v36 = vld [vmem:[%s5500_s0 + $0x50] sm:$0xf0]  ;;  %v3538_v37 = vld [vmem:[%s5500_s0 + $0x3c] sm:$0xf]  ;;  %v3034_v40 = vor.u32 %v3594_v33, %v3031_v34 }
  0x15   :  { %v2807_v38 = vld [vmem:[%s5500_s0 + $0x54] sm:$0xf0]  ;;  %v2806_v41 = vor.u32 %v3541_v36, %v2805_v35  ;;  %v3663_v43 = vld [vmem:[%s5501_s1 + $0xa0] sm:$0xff]  ;;  %v3057_v44 = vld [vmem:[%s5500_s0 + $0x230] sm:$0xf] }
  0x16   :  { %3721 = vmatpush.bf16.msra.mxu2 %v3645_v10  ;;  %v2810_v42 = vor.u32 %v3538_v37, %v2807_v38  ;;  %v3604_v45 = vld [vmem:[%s5500_s0 + $0x248] sm:$0xf0]  ;;  %v3601_v46 = vld [vmem:[%s5500_s0 + $0x234] sm:$0xf]  ;;  %v3059_v47 = vld [vmem:[%s5500_s0 + $0x24c] sm:$0xf0] }
  0x17   :  { %3729 = vmatpush.bf16.msra.mxu3 %v3653_v11  ;;  %v2833_v48 = vld [vmem:[%s5500_s0 + $0x70] sm:$0xf]  ;;  %v3548_v49 = vld [vmem:[%s5500_s0 + $0x88] sm:$0xf0]  ;;  %v3545_v50 = vld [vmem:[%s5500_s0 + $0x74] sm:$0xf]  ;;  %v3058_v52 = vor.u32 %v3604_v45, %v3057_v44  ;;  %v3062_v53 = vor.u32 %v3601_v46, %v3059_v47 }
  0x18   :  { %1172 = vmatpush.bf16.msra.mxu0 %v3645_v10  ;;  %1261 = vmatpush.bf16.msra.mxu1 %v3653_v11  ;;  %v2835_v51 = vld [vmem:[%s5500_s0 + $0x8c] sm:$0xf0]  ;;  %v2834_v54 = vor.u32 %v3548_v49, %v2833_v48  ;;  %v3662_v56 = vld [vmem:[%s5501_s1 + $0x98] sm:$0xff]  ;;  %v3085_v57 = vld [vmem:[%s5500_s0 + $0x268] sm:$0xf] }
  0x19   :  { %v2838_v55 = vor.u32 %v3545_v50, %v2835_v51  ;;  %v3611_v58 = vld [vmem:[%s5500_s0 + $0x280] sm:$0xf0]  ;;  %v3608_v59 = vld [vmem:[%s5500_s0 + $0x26c] sm:$0xf]  ;;  %v3087_v60 = vld [vmem:[%s5500_s0 + $0x284] sm:$0xf0] }
  0x1a   :  { %3722 = vmatpush.bf16.msra.mxu2 %v3644_v12  ;;  %v2861_v61 = vld [vmem:[%s5500_s0 + $0xa8] sm:$0xf]  ;;  %v3555_v62 = vld [vmem:[%s5500_s0 + $0xc0] sm:$0xf0]  ;;  %v3552_v63 = vld [vmem:[%s5500_s0 + $0xac] sm:$0xf]  ;;  %v3086_v1 = vor.u32 %v3611_v58, %v3085_v57  ;;  %v3090_v2 = vor.u32 %v3608_v59, %v3087_v60 }
  0x1b   :  { %3730 = vmatpush.bf16.msra.mxu3 %v3652_v13  ;;  %v2863_v0 = vld [vmem:[%s5500_s0 + $0xc4] sm:$0xf0]  ;;  %v2862_v3 = vor.u32 %v3555_v62, %v2861_v61  ;;  %v3661_v5 = vld [vmem:[%s5501_s1 + $0x90] sm:$0xff]  ;;  %v3113_v6 = vld [vmem:[%s5500_s0 + $0x2a0] sm:$0xf] }
  0x1c   :  { %1173 = vmatpush.bf16.msra.mxu0 %v3644_v12  ;;  %1262 = vmatpush.bf16.msra.mxu1 %v3652_v13  ;;  %v2866_v4 = vor.u32 %v3552_v63, %v2863_v0  ;;  %v3618_v7 = vld [vmem:[%s5500_s0 + $0x2b8] sm:$0xf0]  ;;  %v3615_v8 = vld [vmem:[%s5500_s0 + $0x2a4] sm:$0xf]  ;;  %v3115_v9 = vld [vmem:[%s5500_s0 + $0x2bc] sm:$0xf0] }
  0x1d   :  { %v2889_v10 = vld [vmem:[%s5500_s0 + $0xe0] sm:$0xf]  ;;  %v3562_v11 = vld [vmem:[%s5500_s0 + $0xf8] sm:$0xf0]  ;;  %v3559_v12 = vld [vmem:[%s5500_s0 + $0xe4] sm:$0xf] }
  0x1e   :  { %3723 = vmatpush.bf16.msra.mxu2 %v3643_v14  ;;  %v2891_v13 = vld [vmem:[%s5500_s0 + $0xfc] sm:$0xf0]  ;;  %v2890_v16 = vor.u32 %v3562_v11, %v2889_v10  ;;  %v3660_v18 = vld [vmem:[%s5501_s1 + $0x88] sm:$0xff]  ;;  %v3674_v19 = vld [vmem:[%s5501_s1 + $0xf8] sm:$0xff] }
  0x1f   :  { %3731 = vmatpush.bf16.msra.mxu3 %v3651_v15  ;;  %v2894_v17 = vor.u32 %v3559_v12, %v2891_v13  ;;  %v3673_v21 = vld [vmem:[%s5501_s1 + $0xf0] sm:$0xff]  ;;  %v3690_v22 = vld [vmem:[%s5501_s1 + $0x178] sm:$0xff]  ;;  %v3672_v24 = vld [vmem:[%s5501_s1 + $0xe8] sm:$0xff] }
  0x20   :  { %1174 = vmatpush.bf16.msra.mxu0 %v3643_v14  ;;  %1263 = vmatpush.bf16.msra.mxu1 %v3651_v15  ;;  %v3114_v14 = vor.u32 %v3618_v7, %v3113_v6  ;;  %v3118_v15 = vor.u32 %v3615_v8, %v3115_v9  ;;  %v3681_v23 = vld [vmem:[%s5501_s1 + $0x130] sm:$0xff]  ;;  %v3566_v31 = vld [vmem:[%s5500_s0 + $0x11c] sm:$0xf]  ;;  %v2919_v32 = vld [vmem:[%s5500_s0 + $0x134] sm:$0xf0] }
  0x21   :  { %1215 = vmatmul.bf16.vlgmr.msra.gmra.mxu2 %v3002_v25  ;;  %v3141_v25 = vld [vmem:[%s5500_s0 + $0x2d8] sm:$0xf]  ;;  %v3671_v33 = vld [vmem:[%s5501_s1 + $0xe0] sm:$0xff]  ;;  %v2922_v37 = vor.u32 %v3566_v31, %v2919_v32  ;;  %v3689_v38 = vld [vmem:[%s5501_s1 + $0x170] sm:$0xff] }
  0x22   :  { %1345 = vmatpush.bf16.msrb.mxu2 %v3666_v20  ;;  %1304 = vmatmul.bf16.vlgmr.msra.gmra.mxu3 %v3006_v26  ;;  %v3682_v20 = vld [vmem:[%s5501_s1 + $0x138] sm:$0xff]  ;;  %v3625_v26 = vld [vmem:[%s5500_s0 + $0x2f0] sm:$0xf0]  ;;  %v3679_v44 = vld [vmem:[%s5501_s1 + $0x120] sm:$0xff] }
  0x23   :  { %1175 = vmatmul.bf16.vlgmr.msra.gmra.mxu0 %v2778_v27  ;;  %1264 = vmatmul.bf16.vlgmr.msra.gmra.mxu1 %v2782_v28  ;;  %v3622_v27 = vld [vmem:[%s5500_s0 + $0x2dc] sm:$0xf]  ;;  %v3143_v28 = vld [vmem:[%s5500_s0 + $0x2f4] sm:$0xf0]  ;;  %v3142_v34 = vor.u32 %v3625_v26, %v3141_v25  ;;  %v3687_v45 = vld [vmem:[%s5501_s1 + $0x160] sm:$0xff] }
  0x24   :  { %1434 = vmatpush.bf16.msrb.mxu3 %v3674_v19  ;;  %1523 = vmatpush.bf16.msrb.mxu0 %v3682_v20  ;;  %v3146_v35 = vor.u32 %v3622_v27, %v3143_v28  ;;  %v3668_v46 = vld [vmem:[%s5501_s1 + $0xc8] sm:$0xff]  ;;  %v3678_v47 = vld [vmem:[%s5501_s1 + $0x118] sm:$0xff]  ;;  %v3169_v48 = vld [vmem:[%s5500_s0 + $0x310] sm:$0xf] }
  0x25   :  { %1612 = vmatpush.bf16.msrb.mxu1 %v3690_v22  ;;  %v3632_v49 = vld [vmem:[%s5500_s0 + $0x328] sm:$0xf0]  ;;  %v3629_v50 = vld [vmem:[%s5500_s0 + $0x314] sm:$0xf]  ;;  %v3171_v51 = vld [vmem:[%s5500_s0 + $0x32c] sm:$0xf0] }
  0x26   :  { %1346 = vmatpush.bf16.msrb.mxu2 %v3665_v29  ;;  %v2917_v29 = vld [vmem:[%s5500_s0 + $0x118] sm:$0xf]  ;;  %v3667_v57 = vld [vmem:[%s5501_s1 + $0xc0] sm:$0xff]  ;;  %v3677_v58 = vld [vmem:[%s5501_s1 + $0x110] sm:$0xff]  ;;  %v3170_v59 = vor.u32 %v3632_v49, %v3169_v48  ;;  %v3174_v60 = vor.u32 %v3629_v50, %v3171_v51 }
  0x27   :  { %v3685_v63 = vld [vmem:[%s5501_s1 + $0x150] sm:$0xff]  ;;  %v3691_v0 = vld [vmem:[%s5501_s1 + $0x180] sm:$0xff]  ;;  %v3636_v7 = vld [vmem:[%s5500_s0 + $0x34c] sm:$0xf] }
  0x28   :  { %1435 = vmatpush.bf16.msrb.mxu3 %v3673_v21  ;;  %1524 = vmatpush.bf16.msrb.mxu0 %v3681_v23  ;;  %v3639_v6 = vld [vmem:[%s5500_s0 + $0x360] sm:$0xf0]  ;;  %v3199_v8 = vld [vmem:[%s5500_s0 + $0x364] sm:$0xf0]  ;;  %v3580_v11 = vld [vmem:[%s5500_s0 + $0x18c] sm:$0xf] }
  0x29   :  { %1613 = vmatpush.bf16.msrb.mxu1 %v3689_v38  ;;  %v2973_v9 = vld [vmem:[%s5500_s0 + $0x188] sm:$0xf]  ;;  %v3583_v10 = vld [vmem:[%s5500_s0 + $0x1a0] sm:$0xf0]  ;;  %v3532_v19 = vld [vmem:[%s5500_s0 + $0xc] sm:$0xf] }
  0x2a   :  { %1347 = vmatpush.bf16.msrb.mxu2 %v3664_v30  ;;  %v3569_v30 = vld [vmem:[%s5500_s0 + $0x130] sm:$0xf0]  ;;  %v2975_v12 = vld [vmem:[%s5500_s0 + $0x1a4] sm:$0xf0]  ;;  %v2793_v21 = vld [vmem:[%s5500_s0 + $0x10] sm:$0xf] }
  0x2b   :  { %v2918_v36 = vor.u32 %v3569_v30, %v2917_v29  ;;  %v2787_v20 = vld [vmem:[%s5500_s0 + $0x24] sm:$0xf0]  ;;  %v3536_v22 = vld [vmem:[%s5500_s0 + $0x28] sm:$0xf0]  ;;  %v3533_v23 = vld [vmem:[%s5500_s0 + $0x14] sm:$0xf] }
  0x2c   :  { %1436 = vmatpush.bf16.msrb.mxu3 %v3672_v24  ;;  %v2795_v24 = vld [vmem:[%s5500_s0 + $0x2c] sm:$0xf0]  ;;  %v2790_v26 = vor.u32 %v3532_v19, %v2787_v20  ;;  %v4312_v27 = vld [vmem:[%s5502_s2] ss:$0 sm:$0xff]  ;;  %v2794_v28 = vor.u32 %v3536_v22, %v2793_v21  ;;  %v3540_v50 = vld [vmem:[%s5500_s0 + $0x4c] sm:$0xf] }
  0x2d   :  { %v2798_v30 = vor.u32 %v3533_v23, %v2795_v24  ;;  %v2823_v51 = vld [vmem:[%s5500_s0 + $0x64] sm:$0xf0] }
  0x2e   :  { %1348 = vmatpush.bf16.msrb.mxu2 %v3663_v43  ;;  %v3669_v43 = vld [vmem:[%s5501_s1 + $0xd0] sm:$0xff] }
  0x30   :  { %1437 = vmatpush.bf16.msrb.mxu3 %v3671_v33 }
  0x31   :  { %1220 = vmatmul.bf16.gmra.mxu2 %v3030_v39  ;;  %v3659_v39 = vld [vmem:[%s5501_s1 + $0x80] sm:$0xff] }
  0x32   :  { %1309 = vmatmul.bf16.gmra.mxu3 %v3034_v40  ;;  %1349 = vmatpush.bf16.msrb.mxu2 %v3662_v56  ;;  %v3670_v40 = vld [vmem:[%s5501_s1 + $0xd8] sm:$0xff]  ;;  %v2947_v56 = vld [vmem:[%s5500_s0 + $0x16c] sm:$0xf0] }
  0x33   :  { %1180 = vmatmul.bf16.gmra.mxu0 %v2806_v41  ;;  %1269 = vmatmul.bf16.gmra.mxu1 %v2810_v42  ;;  %v3680_v41 = vld [vmem:[%s5501_s1 + $0x128] sm:$0xff] }
  0x34   :  { %v3688_v42 = vld [vmem:[%s5501_s1 + $0x168] sm:$0xff]  ;;  %1438 = vmatpush.bf16.msrb.mxu3 %v3670_v40  ;;  %1525 = vmatpush.bf16.msrb.mxu0 %v3680_v41  ;;  %v2813_v41 = vld [vmem:[%s5500_s0 + $0x40] sm:$0xf] }
  0x35   :  { %1614 = vmatpush.bf16.msrb.mxu1 %v3688_v42  ;;  %v3542_v42 = vld [vmem:[%s5500_s0 + $0x58] sm:$0xf0] }
  0x36   :  { %1350 = vmatpush.bf16.msrb.mxu2 %v3661_v5  ;;  %v3197_v5 = vld [vmem:[%s5500_s0 + $0x348] sm:$0xf] }
  0x37   :  { %v3198_v13 = vor.u32 %v3639_v6, %v3197_v5  ;;  %v2841_v5 = vld [vmem:[%s5500_s0 + $0x78] sm:$0xf]  ;;  %v3549_v6 = vld [vmem:[%s5500_s0 + $0x90] sm:$0xf0] }
  0x38   :  { %1439 = vmatpush.bf16.msrb.mxu3 %v3669_v43  ;;  %1526 = vmatpush.bf16.msrb.mxu0 %v3679_v44  ;;  %v3539_v44 = vld [vmem:[%s5500_s0 + $0x44] sm:$0xf] }
  0x39   :  { %1615 = vmatpush.bf16.msrb.mxu1 %v3687_v45  ;;  %v2815_v45 = vld [vmem:[%s5500_s0 + $0x5c] sm:$0xf0] }
  0x3a   :  { %1351 = vmatpush.bf16.msrb.mxu2 %v3660_v18  ;;  %v3535_v18 = vld [vmem:[%s5500_s0 + $0x20] sm:$0xf0] }
  0x3c   :  { %1440 = vmatpush.bf16.msrb.mxu3 %v3668_v46  ;;  %1527 = vmatpush.bf16.msrb.mxu0 %v3678_v47  ;;  %v2821_v46 = vld [vmem:[%s5500_s0 + $0x48] sm:$0xf]  ;;  %v3543_v47 = vld [vmem:[%s5500_s0 + $0x60] sm:$0xf0] }
  0x3e   :  { %1352 = vmatpush.bf16.msrb.mxu2 %v3659_v39 }
  0x40   :  { %1441 = vmatpush.bf16.msrb.mxu3 %v3667_v57  ;;  %1528 = vmatpush.bf16.msrb.mxu0 %v3677_v58  ;;  %v2826_v58 = vor.u32 %v3540_v50, %v2823_v51 }
  0x41   :  { %1225 = vmatmul.bf16.gmra.mxu2 %v3058_v52  ;;  %v3686_v52 = vld [vmem:[%s5501_s1 + $0x158] sm:$0xff] }
  0x42   :  { %1314 = vmatmul.bf16.gmra.mxu3 %v3062_v53  ;;  %v2945_v53 = vld [vmem:[%s5500_s0 + $0x150] sm:$0xf]  ;;  %1616 = vmatpush.bf16.msrb.mxu1 %v3686_v52 }
  0x43   :  { %1185 = vmatmul.bf16.gmra.mxu0 %v2834_v54  ;;  %1274 = vmatmul.bf16.gmra.mxu1 %v2838_v55  ;;  %v3576_v54 = vld [vmem:[%s5500_s0 + $0x168] sm:$0xf0]  ;;  %v3573_v55 = vld [vmem:[%s5500_s0 + $0x154] sm:$0xf] }
  0x44   :  { %v2946_v61 = vor.u32 %v3576_v54, %v2945_v53  ;;  %v2950_v62 = vor.u32 %v3573_v55, %v2947_v56  ;;  %1708 = vmatpush.bf16.msra.mxu2 %v3691_v0  ;;  %v2814_v53 = vor.u32 %v3542_v42, %v2813_v41  ;;  %v2818_v54 = vor.u32 %v3539_v44, %v2815_v45  ;;  %v2877_v41 = vld [vmem:[%s5500_s0 + $0xb8] sm:$0xf]  ;;  %v3557_v42 = vld [vmem:[%s5500_s0 + $0xd0] sm:$0xf0] }
  0x45   :  { %v2822_v55 = vor.u32 %v3543_v47, %v2821_v46  ;;  %v3554_v46 = vld [vmem:[%s5500_s0 + $0xbc] sm:$0xf]  ;;  %v2879_v47 = vld [vmem:[%s5500_s0 + $0xd4] sm:$0xf0]  ;;  %v2878_v51 = vor.u32 %v3557_v42, %v2877_v41 }
  0x46   :  { %1617 = vmatpush.bf16.msrb.mxu1 %v3685_v63  ;;  %v3570_v41 = vld [vmem:[%s5500_s0 + $0x138] sm:$0xf0] }
  0x51   :  { %1230 = vmatmul.bf16.gmra.mxu2 %v3086_v1  ;;  %v3676_v1 = vld [vmem:[%s5501_s1 + $0x108] sm:$0xff] }
  0x52   :  { %1319 = vmatmul.bf16.gmra.mxu3 %v3090_v2  ;;  %1529 = vmatpush.bf16.msrb.mxu0 %v3676_v1  ;;  %v3684_v2 = vld [vmem:[%s5501_s1 + $0x148] sm:$0xff] }
  0x53   :  { %1190 = vmatmul.bf16.gmra.mxu0 %v2862_v3  ;;  %1279 = vmatmul.bf16.gmra.mxu1 %v2866_v4  ;;  %v3675_v3 = vld [vmem:[%s5501_s1 + $0x100] sm:$0xff] }
  0x54   :  { %1618 = vmatpush.bf16.msrb.mxu1 %v3684_v2  ;;  %v3683_v4 = vld [vmem:[%s5501_s1 + $0x140] sm:$0xff] }
  0x56   :  { %1530 = vmatpush.bf16.msrb.mxu0 %v3675_v3 }
  0x58   :  { %1619 = vmatpush.bf16.msrb.mxu1 %v3683_v4 }
  0x61   :  { %1235 = vmatmul.bf16.gmra.mxu2 %v3114_v14  ;;  %v3202_v14 = vor.u32 %v3636_v7, %v3199_v8  ;;  %v3546_v8 = vld [vmem:[%s5500_s0 + $0x7c] sm:$0xf] }
  0x62   :  { %1324 = vmatmul.bf16.gmra.mxu3 %v3118_v15  ;;  %v2974_v15 = vor.u32 %v3583_v10, %v2973_v9  ;;  %v2843_v9 = vld [vmem:[%s5500_s0 + $0x94] sm:$0xf0]  ;;  %v2849_v10 = vld [vmem:[%s5500_s0 + $0x80] sm:$0xf] }
  0x63   :  { %1195 = vmatmul.bf16.gmra.mxu0 %v2890_v16  ;;  %1284 = vmatmul.bf16.gmra.mxu1 %v2894_v17  ;;  %v2978_v16 = vor.u32 %v3580_v11, %v2975_v12  ;;  %v2785_v17 = vld [vmem:[%s5500_s0 + $0x8] sm:$0xf]  ;;  %v3550_v11 = vld [vmem:[%s5500_s0 + $0x98] sm:$0xf0] }
  0x64   :  { %v2786_v25 = vor.u32 %v3535_v18, %v2785_v17  ;;  %v2842_v17 = vor.u32 %v3549_v6, %v2841_v5  ;;  %v2846_v18 = vor.u32 %v3546_v8, %v2843_v9  ;;  %v2850_v19 = vor.u32 %v3550_v11, %v2849_v10  ;;  %v3563_v5 = vld [vmem:[%s5500_s0 + $0x100] sm:$0xf0]  ;;  %v3560_v8 = vld [vmem:[%s5500_s0 + $0xec] sm:$0xf]  ;;  %v2899_v9 = vld [vmem:[%s5500_s0 + $0x104] sm:$0xf0] }
  0x65   :  { %v2905_v10 = vld [vmem:[%s5500_s0 + $0xf0] sm:$0xf]  ;;  %v3564_v11 = vld [vmem:[%s5500_s0 + $0x108] sm:$0xf0] }
  0x71   :  { %1240 = vmatmul.bf16.gmra.mxu2 %v3142_v34 }
  0x72   :  { %1329 = vmatmul.bf16.gmra.mxu3 %v3146_v35 }
  0x73   :  { %1200 = vmatmul.bf16.gmra.mxu0 %v2918_v36  ;;  %1289 = vmatmul.bf16.gmra.mxu1 %v2922_v37 }
  0x81   :  { %1245 = vmatmul.bf16.gmra.mxu2 %v3170_v59 }
  0x82   :  { %1334 = vmatmul.bf16.gmra.mxu3 %v3174_v60 }
  0x83   :  { %1205 = vmatmul.bf16.gmra.mxu0 %v2946_v61  ;;  %1294 = vmatmul.bf16.gmra.mxu1 %v2950_v62 }
  0x91   :  { %1250 = vmatmul.bf16.gmra.mxu2 %v3198_v13 }
  0x92   :  { %1339 = vmatmul.bf16.gmra.mxu3 %v3202_v14  ;;  %v3547_v14 = vld [vmem:[%s5500_s0 + $0x84] sm:$0xf] }
  0x93   :  { %1210 = vmatmul.bf16.gmra.mxu0 %v2974_v15  ;;  %1299 = vmatmul.bf16.gmra.mxu1 %v2978_v16  ;;  %v2851_v15 = vld [vmem:[%s5500_s0 + $0x9c] sm:$0xf0] }
  0x94   :  { %v2854_v22 = vor.u32 %v3547_v14, %v2851_v15  ;;  %v3561_v14 = vld [vmem:[%s5500_s0 + $0xf4] sm:$0xf]  ;;  %v2907_v15 = vld [vmem:[%s5500_s0 + $0x10c] sm:$0xf0] }
  0xa0   :  { %v1176_v29 = vpop.f32.mrf.mxu0  ;;  %v1265_v32 = vpop.f32.mrf.mxu1 }
  0xa1   :  { %v1177_v31 = vadd.f32 %v4312_v27, %v1176_v29  ;;  %1353 = vmatmul.bf16.vlgmr.msrb.gmra.mxu2 %v2786_v25 }
  0xa2   :  { %1442 = vmatmul.bf16.vlgmr.msrb.gmra.mxu3 %v2790_v26 }
  0xa3   :  { %v4315_v33 = vadd.f32 %v1265_v32, %v1177_v31  ;;  %1531 = vmatmul.bf16.vlgmr.msrb.gmra.mxu0 %v2794_v28  ;;  %1620 = vmatmul.bf16.vlgmr.msrb.gmra.mxu1 %v2798_v30 }
  0xa4   :  { %v1216_v34 = vpop.f32.mrf.mxu2 }
  0xa5   :  { %v1305_v35 = vpop.f32.mrf.mxu3  ;;  %v1217_v36 = vadd.f32 %v4312_v27, %v1216_v34 }
  0xa7   :  { %v4318_v37 = vadd.f32 %v1305_v35, %v1217_v36  ;;  %v2869_v35 = vld [vmem:[%s5500_s0 + $0xb0] sm:$0xf]  ;;  %v3556_v36 = vld [vmem:[%s5500_s0 + $0xc8] sm:$0xf0] }
  0xa8   :  { %v1178_v38 = vpop.f32.mrf.mxu0  ;;  %v1267_v40 = vpop.f32.mrf.mxu1 }
  0xa9   :  { %v1179_v39 = vadd.f32 %v4312_v27, %v1178_v38 }
  0xab   :  { %v4327_v43 = vadd.f32 %v1267_v40, %v1179_v39  ;;  %v3553_v39 = vld [vmem:[%s5500_s0 + $0xb4] sm:$0xf]  ;;  %v2871_v40 = vld [vmem:[%s5500_s0 + $0xcc] sm:$0xf0] }
  0xac   :  { %v1218_v48 = vpop.f32.mrf.mxu2  ;;  %v2874_v50 = vor.u32 %v3553_v39, %v2871_v40  ;;  %v2925_v40 = vld [vmem:[%s5500_s0 + $0x120] sm:$0xf] }
  0xad   :  { %v1307_v49 = vpop.f32.mrf.mxu3  ;;  %v1219_v52 = vadd.f32 %v4312_v27, %v1218_v48 }
  0xaf   :  { %v4348_v56 = vadd.f32 %v1307_v49, %v1219_v52  ;;  %v2870_v49 = vor.u32 %v3556_v36, %v2869_v35 }
  0xb0   :  { %v1181_v57 = vpop.f32.mrf.mxu0  ;;  %v1270_v60 = vpop.f32.mrf.mxu1 }
  0xb1   :  { %v1182_v59 = vadd.f32 %v4312_v27, %v1181_v57  ;;  %1358 = vmatmul.bf16.gmra.mxu2 %v2814_v53 }
  0xb2   :  { %1447 = vmatmul.bf16.gmra.mxu3 %v2818_v54  ;;  %v2882_v54 = vor.u32 %v3554_v46, %v2879_v47  ;;  %v2933_v46 = vld [vmem:[%s5500_s0 + $0x128] sm:$0xf]  ;;  %v3571_v47 = vld [vmem:[%s5500_s0 + $0x140] sm:$0xf0] }
  0xb3   :  { %v4351_v61 = vadd.f32 %v1270_v60, %v1182_v59  ;;  %1536 = vmatmul.bf16.gmra.mxu0 %v2822_v55  ;;  %1625 = vmatmul.bf16.gmra.mxu1 %v2826_v58 }
  0xb4   :  { %v1221_v62 = vpop.f32.mrf.mxu2 }
  0xb5   :  { %v1310_v63 = vpop.f32.mrf.mxu3  ;;  %v1222_v0 = vadd.f32 %v4312_v27, %v1221_v62 }
  0xb7   :  { %v4354_v1 = vadd.f32 %v1310_v63, %v1222_v0 }
  0xb8   :  { %v1183_v2 = vpop.f32.mrf.mxu0  ;;  %v1272_v4 = vpop.f32.mrf.mxu1 }
  0xb9   :  { %v1184_v3 = vadd.f32 %v4312_v27, %v1183_v2 }
  0xbb   :  { %v4363_v7 = vadd.f32 %v1272_v4, %v1184_v3  ;;  %v2897_v4 = vld [vmem:[%s5500_s0 + $0xe8] sm:$0xf] }
  0xbc   :  { %v1223_v12 = vpop.f32.mrf.mxu2 }
  0xbd   :  { %v1312_v13 = vpop.f32.mrf.mxu3  ;;  %v1224_v16 = vadd.f32 %v4312_v27, %v1223_v12 }
  0xbf   :  { %v4384_v20 = vadd.f32 %v1312_v13, %v1224_v16 }
  0xc0   :  { %v1186_v21 = vpop.f32.mrf.mxu0  ;;  %v1275_v24 = vpop.f32.mrf.mxu1 }
  0xc1   :  { %v1187_v23 = vadd.f32 %v4312_v27, %v1186_v21  ;;  %1363 = vmatmul.bf16.gmra.mxu2 %v2842_v17  ;;  %v2898_v17 = vor.u32 %v3563_v5, %v2897_v4 }
  0xc2   :  { %1452 = vmatmul.bf16.gmra.mxu3 %v2846_v18  ;;  %v2902_v18 = vor.u32 %v3560_v8, %v2899_v9 }
  0xc3   :  { %v4387_v25 = vadd.f32 %v1275_v24, %v1187_v23  ;;  %1541 = vmatmul.bf16.gmra.mxu0 %v2850_v19  ;;  %1630 = vmatmul.bf16.gmra.mxu1 %v2854_v22  ;;  %v2906_v19 = vor.u32 %v3564_v11, %v2905_v10  ;;  %v2910_v23 = vor.u32 %v3561_v14, %v2907_v15  ;;  %v3577_v14 = vld [vmem:[%s5500_s0 + $0x170] sm:$0xf0] }
  0xc4   :  { %v1226_v26 = vpop.f32.mrf.mxu2 }
  0xc5   :  { %v1315_v28 = vpop.f32.mrf.mxu3  ;;  %v1227_v29 = vadd.f32 %v4312_v27, %v1226_v26 }
  0xc7   :  { %v4390_v30 = vadd.f32 %v1315_v28, %v1227_v29 }
  0xc8   :  { %v1188_v31 = vpop.f32.mrf.mxu0  ;;  %v1277_v34 = vpop.f32.mrf.mxu1 }
  0xc9   :  { %v1189_v32 = vadd.f32 %v4312_v27, %v1188_v31 }
  0xcb   :  { %v4399_v38 = vadd.f32 %v1277_v34, %v1189_v32 }
  0xcc   :  { %v1228_v44 = vpop.f32.mrf.mxu2 }
  0xcd   :  { %v1317_v45 = vpop.f32.mrf.mxu3  ;;  %v1229_v48 = vadd.f32 %v4312_v27, %v1228_v44  ;;  %v3567_v44 = vld [vmem:[%s5500_s0 + $0x124] sm:$0xf] }
  0xcf   :  { %v4420_v52 = vadd.f32 %v1317_v45, %v1229_v48  ;;  %v2927_v45 = vld [vmem:[%s5500_s0 + $0x13c] sm:$0xf0] }
  0xd0   :  { %v1191_v53 = vpop.f32.mrf.mxu0  ;;  %v1280_v57 = vpop.f32.mrf.mxu1 }
  0xd1   :  { %v1192_v55 = vadd.f32 %v4312_v27, %v1191_v53  ;;  %1368 = vmatmul.bf16.gmra.mxu2 %v2870_v49 }
  0xd2   :  { %1457 = vmatmul.bf16.gmra.mxu3 %v2874_v50  ;;  %v3568_v50 = vld [vmem:[%s5500_s0 + $0x12c] sm:$0xf] }
  0xd3   :  { %v4423_v58 = vadd.f32 %v1280_v57, %v1192_v55  ;;  %1546 = vmatmul.bf16.gmra.mxu0 %v2878_v51  ;;  %1635 = vmatmul.bf16.gmra.mxu1 %v2882_v54  ;;  %v2935_v51 = vld [vmem:[%s5500_s0 + $0x144] sm:$0xf0]  ;;  %v2926_v54 = vor.u32 %v3570_v41, %v2925_v40  ;;  %v2930_v55 = vor.u32 %v3567_v44, %v2927_v45 }
  0xd4   :  { %v1231_v59 = vpop.f32.mrf.mxu2  ;;  %v2934_v57 = vor.u32 %v3571_v47, %v2933_v46 }
  0xd5   :  { %v1320_v60 = vpop.f32.mrf.mxu3  ;;  %v1232_v62 = vadd.f32 %v4312_v27, %v1231_v59 }
  0xd7   :  { %v4426_v63 = vadd.f32 %v1320_v60, %v1232_v62  ;;  %v2938_v62 = vor.u32 %v3568_v50, %v2935_v51 }
  0xd8   :  { %v1193_v0 = vpop.f32.mrf.mxu0  ;;  %v1282_v3 = vpop.f32.mrf.mxu1 }
  0xd9   :  { %v1194_v2 = vadd.f32 %v4312_v27, %v1193_v0 }
  0xdb   :  { %v4435_v6 = vadd.f32 %v1282_v3, %v1194_v2 }
  0xdc   :  { %v1233_v12 = vpop.f32.mrf.mxu2 }
  0xdd   :  { %v1322_v13 = vpop.f32.mrf.mxu3  ;;  %v1234_v16 = vadd.f32 %v4312_v27, %v1233_v12 }
  0xdf   :  { %v4456_v21 = vadd.f32 %v1322_v13, %v1234_v16  ;;  %v2953_v13 = vld [vmem:[%s5500_s0 + $0x158] sm:$0xf]  ;;  %v3574_v16 = vld [vmem:[%s5500_s0 + $0x15c] sm:$0xf] }
  0xe0   :  { %v1196_v22 = vpop.f32.mrf.mxu0  ;;  %v1285_v26 = vpop.f32.mrf.mxu1 }
  0xe1   :  { %v1197_v24 = vadd.f32 %v4312_v27, %v1196_v22  ;;  %1373 = vmatmul.bf16.gmra.mxu2 %v2898_v17  ;;  %v2955_v17 = vld [vmem:[%s5500_s0 + $0x174] sm:$0xf0] }
  0xe2   :  { %1462 = vmatmul.bf16.gmra.mxu3 %v2902_v18  ;;  %v2961_v18 = vld [vmem:[%s5500_s0 + $0x160] sm:$0xf] }
  0xe3   :  { %v4459_v28 = vadd.f32 %v1285_v26, %v1197_v24  ;;  %1551 = vmatmul.bf16.gmra.mxu0 %v2906_v19  ;;  %1640 = vmatmul.bf16.gmra.mxu1 %v2910_v23  ;;  %v3578_v19 = vld [vmem:[%s5500_s0 + $0x178] sm:$0xf0]  ;;  %v3575_v24 = vld [vmem:[%s5500_s0 + $0x164] sm:$0xf]  ;;  %v2963_v26 = vld [vmem:[%s5500_s0 + $0x17c] sm:$0xf0] }
  0xe4   :  { %v1236_v29 = vpop.f32.mrf.mxu2  ;;  %v2966_v40 = vor.u32 %v3575_v24, %v2963_v26  ;;  %v3699_v24 = vld [vmem:[%s5503_s3 + $0x38] sm:$0xff] }
  0xe5   :  { %v1325_v31 = vpop.f32.mrf.mxu3  ;;  %v1237_v32 = vadd.f32 %v4312_v27, %v1236_v29  ;;  %1906 = vmatpush.bf16.msra.mxu3 %v3699_v24  ;;  %v3598_v24 = vld [vmem:[%s5500_s0 + $0x218] sm:$0xf0] }
  0xe7   :  { %v4462_v34 = vadd.f32 %v1325_v31, %v1237_v32  ;;  %v2954_v31 = vor.u32 %v3577_v14, %v2953_v13  ;;  %v2958_v32 = vor.u32 %v3574_v16, %v2955_v17 }
  0xe8   :  { %v1198_v35 = vpop.f32.mrf.mxu0  ;;  %v1287_v39 = vpop.f32.mrf.mxu1 }
  0xe9   :  { %v1199_v36 = vadd.f32 %v4312_v27, %v1198_v35  ;;  %v2962_v35 = vor.u32 %v3578_v19, %v2961_v18 }
  0xeb   :  { %v4471_v42 = vadd.f32 %v1287_v39, %v1199_v36 }
  0xec   :  { %v1238_v48 = vpop.f32.mrf.mxu2 }
  0xed   :  { %v1327_v49 = vpop.f32.mrf.mxu3  ;;  %v1239_v53 = vadd.f32 %v4312_v27, %v1238_v48 }
  0xef   :  { %v4492_v59 = vadd.f32 %v1327_v49, %v1239_v53 }
  0xf0   :  { %v1201_v60 = vpop.f32.mrf.mxu0  ;;  %v1290_v2 = vpop.f32.mrf.mxu1 }
  0xf1   :  { %v1202_v0 = vadd.f32 %v4312_v27, %v1201_v60  ;;  %1378 = vmatmul.bf16.gmra.mxu2 %v2926_v54  ;;  %v2981_v54 = vld [vmem:[%s5500_s0 + $0x190] sm:$0xf]  ;;  %v3581_v60 = vld [vmem:[%s5500_s0 + $0x194] sm:$0xf] }
  0xf2   :  { %1467 = vmatmul.bf16.gmra.mxu3 %v2930_v55  ;;  %v3584_v55 = vld [vmem:[%s5500_s0 + $0x1a8] sm:$0xf0] }
  0xf3   :  { %v4495_v3 = vadd.f32 %v1290_v2, %v1202_v0  ;;  %1556 = vmatmul.bf16.gmra.mxu0 %v2934_v57  ;;  %1645 = vmatmul.bf16.gmra.mxu1 %v2938_v62  ;;  %v2983_v62 = vld [vmem:[%s5500_s0 + $0x1ac] sm:$0xf0]  ;;  %v2989_v0 = vld [vmem:[%s5500_s0 + $0x198] sm:$0xf]  ;;  %v3585_v2 = vld [vmem:[%s5500_s0 + $0x1b0] sm:$0xf0] }
  0xf4   :  { %v1241_v4 = vpop.f32.mrf.mxu2  ;;  %v2986_v13 = vor.u32 %v3581_v60, %v2983_v62  ;;  %v2990_v14 = vor.u32 %v3585_v2, %v2989_v0  ;;  %v3019_v60 = vld [vmem:[%s5500_s0 + $0x1ec] sm:$0xf0] }
  0xf5   :  { %v1330_v5 = vpop.f32.mrf.mxu3  ;;  %v1242_v8 = vadd.f32 %v4312_v27, %v1241_v4 }
  0xf7   :  { %v4498_v9 = vadd.f32 %v1330_v5, %v1242_v8  ;;  %v3582_v8 = vld [vmem:[%s5500_s0 + $0x19c] sm:$0xf] }
  0xf8   :  { %v1203_v10 = vpop.f32.mrf.mxu0  ;;  %v1292_v12 = vpop.f32.mrf.mxu1 }
  0xf9   :  { %v1204_v11 = vadd.f32 %v4312_v27, %v1203_v10  ;;  %v2991_v10 = vld [vmem:[%s5500_s0 + $0x1b4] sm:$0xf0] }
  0xfa   :  { %v2994_v18 = vor.u32 %v3582_v8, %v2991_v10 }
  0xfb   :  { %v4507_v15 = vadd.f32 %v1292_v12, %v1204_v11  ;;  %v2982_v12 = vor.u32 %v3584_v55, %v2981_v54  ;;  %v3589_v55 = vld [vmem:[%s5500_s0 + $0x1d4] sm:$0xf] }
  0xfc   :  { %v1243_v22 = vpop.f32.mrf.mxu2  ;;  %v3022_v10 = vor.u32 %v3589_v55, %v3019_v60 }
  0xfd   :  { %v1332_v23 = vpop.f32.mrf.mxu3  ;;  %v1244_v29 = vadd.f32 %v4312_v27, %v1243_v22 }
  0xff   :  { %v4528_v36 = vadd.f32 %v1332_v23, %v1244_v29 }
 0x100   :  { %v1206_v39 = vpop.f32.mrf.mxu0  ;;  %v1295_v44 = vpop.f32.mrf.mxu1 }
 0x101   :  { %v1207_v41 = vadd.f32 %v4312_v27, %v1206_v39  ;;  %1383 = vmatmul.bf16.gmra.mxu2 %v2954_v31 }
 0x102   :  { %1472 = vmatmul.bf16.gmra.mxu3 %v2958_v32 }
 0x103   :  { %v4531_v45 = vadd.f32 %v1295_v44, %v1207_v41  ;;  %1561 = vmatmul.bf16.gmra.mxu0 %v2962_v35  ;;  %1650 = vmatmul.bf16.gmra.mxu1 %v2966_v40  ;;  %v3009_v41 = vld [vmem:[%s5500_s0 + $0x1c8] sm:$0xf]  ;;  %v3591_v44 = vld [vmem:[%s5500_s0 + $0x1e0] sm:$0xf0] }
 0x104   :  { %v1246_v46 = vpop.f32.mrf.mxu2  ;;  %v3010_v0 = vor.u32 %v3591_v44, %v3009_v41  ;;  %v3596_v41 = vld [vmem:[%s5500_s0 + $0x20c] sm:$0xf]  ;;  %v3047_v44 = vld [vmem:[%s5500_s0 + $0x224] sm:$0xf0] }
 0x105   :  { %v1335_v47 = vpop.f32.mrf.mxu3  ;;  %v1247_v48 = vadd.f32 %v4312_v27, %v1246_v46  ;;  %v3050_v55 = vor.u32 %v3596_v41, %v3047_v44 }
 0x107   :  { %v4534_v49 = vadd.f32 %v1335_v47, %v1247_v48  ;;  %v3588_v47 = vld [vmem:[%s5500_s0 + $0x1cc] sm:$0xf]  ;;  %v3011_v48 = vld [vmem:[%s5500_s0 + $0x1e4] sm:$0xf0] }
 0x108   :  { %v1208_v50 = vpop.f32.mrf.mxu0  ;;  %v1297_v53 = vpop.f32.mrf.mxu1  ;;  %v3014_v2 = vor.u32 %v3588_v47, %v3011_v48 }
 0x109   :  { %v1209_v51 = vadd.f32 %v4312_v27, %v1208_v50  ;;  %v3017_v50 = vld [vmem:[%s5500_s0 + $0x1d0] sm:$0xf] }
 0x10b   :  { %v4543_v57 = vadd.f32 %v1297_v53, %v1209_v51  ;;  %v3592_v51 = vld [vmem:[%s5500_s0 + $0x1e8] sm:$0xf0] }
 0x10c   :  { %v1248_v4 = vpop.f32.mrf.mxu2 }
 0x10d   :  { %v1337_v5 = vpop.f32.mrf.mxu3  ;;  %v1249_v11 = vadd.f32 %v4312_v27, %v1248_v4  ;;  %v3018_v4 = vor.u32 %v3592_v51, %v3017_v50 }
 0x10f   :  { %v4564_v16 = vadd.f32 %v1337_v5, %v1249_v11 }
 0x110   :  { %v1211_v17 = vpop.f32.mrf.mxu0  ;;  %v1300_v22 = vpop.f32.mrf.mxu1 }
 0x111   :  { %v1212_v19 = vadd.f32 %v4312_v27, %v1211_v17  ;;  %1388 = vmatmul.bf16.gmra.mxu2 %v2982_v12 }
 0x112   :  { %1477 = vmatmul.bf16.gmra.mxu3 %v2986_v13 }
 0x113   :  { %v4567_v23 = vadd.f32 %v1300_v22, %v1212_v19  ;;  %1566 = vmatmul.bf16.gmra.mxu0 %v2990_v14  ;;  %1655 = vmatmul.bf16.gmra.mxu1 %v2994_v18  ;;  %v3037_v22 = vld [vmem:[%s5500_s0 + $0x200] sm:$0xf] }
 0x114   :  { %v1251_v26 = vpop.f32.mrf.mxu2  ;;  %v3038_v48 = vor.u32 %v3598_v24, %v3037_v22  ;;  %v3606_v22 = vld [vmem:[%s5500_s0 + $0x258] sm:$0xf0] }
 0x115   :  { %v1340_v29 = vpop.f32.mrf.mxu3  ;;  %v1252_v31 = vadd.f32 %v4312_v27, %v1251_v26  ;;  %v3595_v26 = vld [vmem:[%s5500_s0 + $0x204] sm:$0xf] }
 0x117   :  { %v4573_v32 = vadd.f32 %v1340_v29, %v1252_v31  ;;  %v3045_v31 = vld [vmem:[%s5500_s0 + $0x208] sm:$0xf] }
 0x118   :  { %v1213_v35 = vpop.f32.mrf.mxu0  ;;  %v1302_v40 = vpop.f32.mrf.mxu1 }
 0x119   :  { %v1214_v39 = vadd.f32 %v4312_v27, %v1213_v35  ;;  %v3599_v35 = vld [vmem:[%s5500_s0 + $0x220] sm:$0xf0] }
 0x11a   :  { %v3046_v51 = vor.u32 %v3599_v35, %v3045_v31  ;;  %v3075_v31 = vld [vmem:[%s5500_s0 + $0x25c] sm:$0xf0] }
 0x11b   :  { %v4582_v46 = vadd.f32 %v1302_v40, %v1214_v39 }
 0x11c   :  { %v1253_v53 = vpop.f32.mrf.mxu2 }
 0x11d   :  { %v1342_v54 = vpop.f32.mrf.mxu3  ;;  %v1254_v62 = vadd.f32 %v4312_v27, %v1253_v53 }
 0x11f   :  { %v4603_v5 = vadd.f32 %v1342_v54, %v1254_v62 }
 0x120   :  { %v1532_v8 = vpop.f32.mrf.mxu0  ;;  %v1621_v11 = vpop.f32.mrf.mxu1 }
 0x121   :  { %1393 = vmatmul.bf16.gmra.mxu2 %v3010_v0 }
 0x122   :  { %1482 = vmatmul.bf16.gmra.mxu3 %v3014_v2  ;;  %v3698_v2 = vld [vmem:[%s5503_s3 + $0x30] sm:$0xff] }
 0x123   :  { %1571 = vmatmul.bf16.gmra.mxu0 %v3018_v4  ;;  %1660 = vmatmul.bf16.gmra.mxu1 %v3022_v10 }
 0x124   :  { %v1354_v12 = vpop.f32.mrf.mxu2  ;;  %1907 = vmatpush.bf16.msra.mxu3 %v3698_v2 }
 0x125   :  { %v1443_v13 = vpop.f32.mrf.mxu3  ;;  %v1355_v14 = vadd.f32 %v1354_v12, %v4315_v33  ;;  %v3039_v33 = vld [vmem:[%s5500_s0 + $0x21c] sm:$0xf0] }
 0x126   :  { %v3042_v50 = vor.u32 %v3595_v26, %v3039_v33  ;;  %v3603_v33 = vld [vmem:[%s5500_s0 + $0x244] sm:$0xf] }
 0x127   :  { %v1444_v17 = vadd.f32 %v1443_v13, %v1355_v14  ;;  %v3065_v14 = vld [vmem:[%s5500_s0 + $0x238] sm:$0xf] }
 0x128   :  { %v1534_v18 = vpop.f32.mrf.mxu0  ;;  %v1623_v19 = vpop.f32.mrf.mxu1 }
 0x129   :  { %v1533_v27 = vadd.f32 %v1532_v8, %v1444_v17  ;;  %v3605_v17 = vld [vmem:[%s5500_s0 + $0x250] sm:$0xf0] }
 0x12b   :  { %v4618_v29 = vadd.f32 %v1621_v11, %v1533_v27  ;;  %v3073_v27 = vld [vmem:[%s5500_s0 + $0x240] sm:$0xf] }
 0x12c   :  { %v1356_v39 = vpop.f32.mrf.mxu2  ;;  %v3074_v41 = vor.u32 %v3606_v22, %v3073_v27 }
 0x12d   :  { %v1445_v40 = vpop.f32.mrf.mxu3  ;;  %v1357_v47 = vadd.f32 %v1356_v39, %v4327_v43  ;;  %v3066_v39 = vor.u32 %v3605_v17, %v3065_v14 }
 0x12f   :  { %v1446_v53 = vadd.f32 %v1445_v40, %v1357_v47 }
 0x130   :  { %v1537_v54 = vpop.f32.mrf.mxu0  ;;  %v1626_v60 = vpop.f32.mrf.mxu1 }
 0x131   :  { %v1535_v62 = vadd.f32 %v1534_v18, %v1446_v53  ;;  %1398 = vmatmul.bf16.gmra.mxu2 %v3038_v48  ;;  %v3602_v18 = vld [vmem:[%s5500_s0 + $0x23c] sm:$0xf]  ;;  %v3078_v48 = vor.u32 %v3603_v33, %v3075_v31 }
 0x132   :  { %1487 = vmatmul.bf16.gmra.mxu3 %v3042_v50 }
 0x133   :  { %1576 = vmatmul.bf16.gmra.mxu0 %v3046_v51  ;;  %v4633_v0 = vadd.f32 %v1623_v19, %v1535_v62  ;;  %1665 = vmatmul.bf16.gmra.mxu1 %v3050_v55 }
 0x134   :  { %v1359_v4 = vpop.f32.mrf.mxu2 }
 0x135   :  { %v1448_v43 = vpop.f32.mrf.mxu3  ;;  %v1360_v8 = vadd.f32 %v1359_v4, %v4351_v61  ;;  %v3067_v61 = vld [vmem:[%s5500_s0 + $0x254] sm:$0xf0]  ;;  %v3093_v4 = vld [vmem:[%s5500_s0 + $0x270] sm:$0xf] }
 0x136   :  { %v3070_v40 = vor.u32 %v3602_v18, %v3067_v61  ;;  %v3610_v18 = vld [vmem:[%s5500_s0 + $0x27c] sm:$0xf]  ;;  %v3103_v61 = vld [vmem:[%s5500_s0 + $0x294] sm:$0xf0] }
 0x137   :  { %v1449_v10 = vadd.f32 %v1448_v43, %v1360_v8  ;;  %v3612_v43 = vld [vmem:[%s5500_s0 + $0x288] sm:$0xf0]  ;;  %v3609_v8 = vld [vmem:[%s5500_s0 + $0x274] sm:$0xf]  ;;  %v3106_v31 = vor.u32 %v3610_v18, %v3103_v61 }
 0x138   :  { %v1539_v11 = vpop.f32.mrf.mxu0  ;;  %v1628_v12 = vpop.f32.mrf.mxu1  ;;  %v3094_v22 = vor.u32 %v3612_v43, %v3093_v4 }
 0x139   :  { %v1538_v13 = vadd.f32 %v1537_v54, %v1449_v10  ;;  %v3095_v10 = vld [vmem:[%s5500_s0 + $0x28c] sm:$0xf0] }
 0x13b   :  { %v4651_v19 = vadd.f32 %v1626_v60, %v1538_v13  ;;  %v3613_v13 = vld [vmem:[%s5500_s0 + $0x290] sm:$0xf0] }
 0x13c   :  { %v1361_v24 = vpop.f32.mrf.mxu2 }
 0x13d   :  { %v1450_v26 = vpop.f32.mrf.mxu3  ;;  %v1362_v35 = vadd.f32 %v1361_v24, %v4363_v7  ;;  %v3098_v24 = vor.u32 %v3609_v8, %v3095_v10  ;;  %v3617_v8 = vld [vmem:[%s5500_s0 + $0x2b4] sm:$0xf]  ;;  %v3131_v10 = vld [vmem:[%s5500_s0 + $0x2cc] sm:$0xf0] }
 0x13e   :  { %v3134_v61 = vor.u32 %v3617_v8, %v3131_v10 }
 0x13f   :  { %v1451_v44 = vadd.f32 %v1450_v26, %v1362_v35 }
 0x140   :  { %v1542_v47 = vpop.f32.mrf.mxu0  ;;  %v1631_v51 = vpop.f32.mrf.mxu1 }
 0x141   :  { %v1540_v50 = vadd.f32 %v1539_v11, %v1451_v44  ;;  %1403 = vmatmul.bf16.gmra.mxu2 %v3066_v39 }
 0x142   :  { %1492 = vmatmul.bf16.gmra.mxu3 %v3070_v40 }
 0x143   :  { %1581 = vmatmul.bf16.gmra.mxu0 %v3074_v41  ;;  %v4666_v53 = vadd.f32 %v1628_v12, %v1540_v50  ;;  %1670 = vmatmul.bf16.gmra.mxu1 %v3078_v48  ;;  %v3101_v12 = vld [vmem:[%s5500_s0 + $0x278] sm:$0xf]  ;;  %v3697_v41 = vld [vmem:[%s5503_s3 + $0x28] sm:$0xff] }
 0x144   :  { %v1364_v54 = vpop.f32.mrf.mxu2  ;;  %v3102_v26 = vor.u32 %v3613_v13, %v3101_v12  ;;  %1908 = vmatpush.bf16.msra.mxu3 %v3697_v41  ;;  %v3623_v41 = vld [vmem:[%s5500_s0 + $0x2e4] sm:$0xf] }
 0x145   :  { %v1453_v55 = vpop.f32.mrf.mxu3  ;;  %v1365_v60 = vadd.f32 %v1364_v54, %v4387_v25  ;;  %v3121_v54 = vld [vmem:[%s5500_s0 + $0x2a8] sm:$0xf] }
 0x147   :  { %v1454_v62 = vadd.f32 %v1453_v55, %v1365_v60  ;;  %v3619_v55 = vld [vmem:[%s5500_s0 + $0x2c0] sm:$0xf0]  ;;  %v3616_v60 = vld [vmem:[%s5500_s0 + $0x2ac] sm:$0xf] }
 0x148   :  { %v1544_v2 = vpop.f32.mrf.mxu0  ;;  %v1633_v11 = vpop.f32.mrf.mxu1  ;;  %v3122_v12 = vor.u32 %v3619_v55, %v3121_v54 }
 0x149   :  { %v1543_v7 = vadd.f32 %v1542_v47, %v1454_v62 }
 0x14b   :  { %v4681_v25 = vadd.f32 %v1631_v51, %v1543_v7  ;;  %v3129_v7 = vld [vmem:[%s5500_s0 + $0x2b0] sm:$0xf] }
 0x14c   :  { %v1366_v14 = vpop.f32.mrf.mxu2 }
 0x14d   :  { %v1455_v17 = vpop.f32.mrf.mxu3  ;;  %v1367_v27 = vadd.f32 %v1366_v14, %v4399_v38 }
 0x14f   :  { %v1456_v33 = vadd.f32 %v1455_v17, %v1367_v27 }
 0x150   :  { %v1547_v40 = vpop.f32.mrf.mxu0  ;;  %v1636_v48 = vpop.f32.mrf.mxu1 }
 0x151   :  { %v1545_v35 = vadd.f32 %v1544_v2, %v1456_v33  ;;  %1408 = vmatmul.bf16.gmra.mxu2 %v3094_v22  ;;  %v3620_v2 = vld [vmem:[%s5500_s0 + $0x2c8] sm:$0xf0] }
 0x152   :  { %1497 = vmatmul.bf16.gmra.mxu3 %v3098_v24  ;;  %v3130_v17 = vor.u32 %v3620_v2, %v3129_v7  ;;  %v3696_v2 = vld [vmem:[%s5503_s3 + $0x20] sm:$0xff] }
 0x153   :  { %1586 = vmatmul.bf16.gmra.mxu0 %v3102_v26  ;;  %v4696_v39 = vadd.f32 %v1633_v11, %v1545_v35  ;;  %1675 = vmatmul.bf16.gmra.mxu1 %v3106_v31 }
 0x154   :  { %v1369_v44 = vpop.f32.mrf.mxu2  ;;  %1909 = vmatpush.bf16.msra.mxu3 %v3696_v2 }
 0x155   :  { %v1458_v47 = vpop.f32.mrf.mxu3  ;;  %v1370_v38 = vadd.f32 %v1369_v44, %v4423_v58  ;;  %v3123_v58 = vld [vmem:[%s5500_s0 + $0x2c4] sm:$0xf0]  ;;  %v3151_v44 = vld [vmem:[%s5500_s0 + $0x2fc] sm:$0xf0] }
 0x156   :  { %v3126_v13 = vor.u32 %v3616_v60, %v3123_v58  ;;  %v3154_v60 = vor.u32 %v3623_v41, %v3151_v44 }
 0x157   :  { %v1459_v50 = vadd.f32 %v1458_v47, %v1370_v38  ;;  %v3627_v47 = vld [vmem:[%s5500_s0 + $0x300] sm:$0xf0] }
 0x158   :  { %v1549_v14 = vpop.f32.mrf.mxu0  ;;  %v1638_v27 = vpop.f32.mrf.mxu1 }
 0x159   :  { %v1548_v51 = vadd.f32 %v1547_v40, %v1459_v50  ;;  %v3626_v40 = vld [vmem:[%s5500_s0 + $0x2f8] sm:$0xf0]  ;;  %v3624_v50 = vld [vmem:[%s5500_s0 + $0x2ec] sm:$0xf] }
 0x15b   :  { %v4714_v62 = vadd.f32 %v1636_v48, %v1548_v51  ;;  %v3159_v51 = vld [vmem:[%s5500_s0 + $0x304] sm:$0xf0] }
 0x15c   :  { %v1371_v4 = vpop.f32.mrf.mxu2  ;;  %v3162_v7 = vor.u32 %v3624_v50, %v3159_v51  ;;  %v3207_v50 = vld [vmem:[%s5500_s0 + $0x36c] sm:$0xf0]  ;;  %v3641_v51 = vld [vmem:[%s5500_s0 + $0x370] sm:$0xf0] }
 0x15d   :  { %v1460_v43 = vpop.f32.mrf.mxu3  ;;  %v1372_v11 = vadd.f32 %v1371_v4, %v4435_v6  ;;  %v3149_v6 = vld [vmem:[%s5500_s0 + $0x2e0] sm:$0xf] }
 0x15e   :  { %v3150_v55 = vor.u32 %v3626_v40, %v3149_v6 }
 0x15f   :  { %v1461_v18 = vadd.f32 %v1460_v43, %v1372_v11  ;;  %v3633_v11 = vld [vmem:[%s5500_s0 + $0x330] sm:$0xf0] }
 0x161   :  { %v1550_v22 = vadd.f32 %v1549_v14, %v1461_v18  ;;  %1413 = vmatmul.bf16.gmra.mxu2 %v3122_v12  ;;  %v3630_v12 = vld [vmem:[%s5500_s0 + $0x31c] sm:$0xf] }
 0x162   :  { %1502 = vmatmul.bf16.gmra.mxu3 %v3126_v13  ;;  %v3179_v13 = vld [vmem:[%s5500_s0 + $0x334] sm:$0xf0]  ;;  %v3634_v14 = vld [vmem:[%s5500_s0 + $0x338] sm:$0xf0] }
 0x163   :  { %1591 = vmatmul.bf16.gmra.mxu0 %v3130_v17  ;;  %v4729_v24 = vadd.f32 %v1638_v27, %v1550_v22  ;;  %1680 = vmatmul.bf16.gmra.mxu1 %v3134_v61  ;;  %v3631_v61 = vld [vmem:[%s5500_s0 + $0x324] sm:$0xf]  ;;  %v3187_v27 = vld [vmem:[%s5500_s0 + $0x33c] sm:$0xf0] }
 0x164   :  { %v1374_v26 = vpop.f32.mrf.mxu2  ;;  %v3190_v6 = vor.u32 %v3631_v61, %v3187_v27 }
 0x165   :  { %v1463_v33 = vpop.f32.mrf.mxu3  ;;  %v1375_v31 = vadd.f32 %v1374_v26, %v4459_v28  ;;  %v3157_v28 = vld [vmem:[%s5500_s0 + $0x2e8] sm:$0xf] }
 0x166   :  { %v3158_v58 = vor.u32 %v3627_v47, %v3157_v28  ;;  %v3205_v47 = vld [vmem:[%s5500_s0 + $0x350] sm:$0xf] }
 0x167   :  { %v4732_v35 = vadd.f32 %v1463_v33, %v1375_v31  ;;  %v3182_v33 = vor.u32 %v3630_v12, %v3179_v13 }
 0x16c   :  { %v1376_v38 = vpop.f32.mrf.mxu2 }
 0x16d   :  { %v4752_v48 = vpop.f32.mrf.mxu3  ;;  %v4761_v54 = vadd.f32 %v1376_v38, %v4471_v42  ;;  %v3177_v42 = vld [vmem:[%s5500_s0 + $0x318] sm:$0xf]  ;;  %v3637_v38 = vld [vmem:[%s5500_s0 + $0x354] sm:$0xf] }
 0x16e   :  { %v3178_v26 = vor.u32 %v3633_v11, %v3177_v42  ;;  %v3695_v11 = vld [vmem:[%s5503_s3 + $0x18] sm:$0xff] }
 0x16f   :  { %1910 = vmatpush.bf16.msra.mxu3 %v3695_v11 }
 0x171   :  { %1418 = vmatmul.bf16.gmra.mxu2 %v3150_v55 }
 0x172   :  { %1507 = vmatmul.bf16.gmra.mxu3 %v3154_v60 }
 0x173   :  { %1596 = vmatmul.bf16.gmra.mxu0 %v3158_v58  ;;  %1685 = vmatmul.bf16.gmra.mxu1 %v3162_v7  ;;  %v3638_v58 = vld [vmem:[%s5500_s0 + $0x35c] sm:$0xf]  ;;  %v3215_v7 = vld [vmem:[%s5500_s0 + $0x374] sm:$0xf0] }
 0x174   :  { %v1379_v4 = vpop.f32.mrf.mxu2  ;;  %v3218_v42 = vor.u32 %v3638_v58, %v3215_v7  ;;  %v2857_v7 = vld [vmem:[%s5500_s0 + $0x88] sm:$0xf] }
 0x175   :  { %v1468_v43 = vpop.f32.mrf.mxu3  ;;  %v1380_v8 = vadd.f32 %v1379_v4, %v4495_v3  ;;  %v3185_v3 = vld [vmem:[%s5500_s0 + $0x320] sm:$0xf] }
 0x176   :  { %v3186_v31 = vor.u32 %v3634_v14, %v3185_v3 }
 0x177   :  { %v4767_v10 = vadd.f32 %v1468_v43, %v1380_v8  ;;  %v3210_v43 = vor.u32 %v3637_v38, %v3207_v50  ;;  %v3694_v50 = vld [vmem:[%s5503_s3 + $0x10] sm:$0xff] }
 0x178   :  { %1911 = vmatpush.bf16.msra.mxu3 %v3694_v50 }
 0x17c   :  { %v1381_v17 = vpop.f32.mrf.mxu2 }
 0x17d   :  { %v4787_v18 = vpop.f32.mrf.mxu3  ;;  %v4796_v22 = vadd.f32 %v1381_v17, %v4507_v15  ;;  %v3640_v15 = vld [vmem:[%s5500_s0 + $0x368] sm:$0xf0]  ;;  %v3537_v17 = vld [vmem:[%s5500_s0 + $0x30] sm:$0xf0] }
 0x17e   :  { %v3206_v4 = vor.u32 %v3640_v15, %v3205_v47 }
 0x181   :  { %1423 = vmatmul.bf16.gmra.mxu2 %v3178_v26 }
 0x182   :  { %1512 = vmatmul.bf16.gmra.mxu3 %v3182_v33 }
 0x183   :  { %1601 = vmatmul.bf16.gmra.mxu0 %v3186_v31  ;;  %1690 = vmatmul.bf16.gmra.mxu1 %v3190_v6 }
 0x184   :  { %v1384_v40 = vpop.f32.mrf.mxu2 }
 0x185   :  { %v1473_v41 = vpop.f32.mrf.mxu3  ;;  %v1385_v44 = vadd.f32 %v1384_v40, %v4531_v45  ;;  %v3213_v45 = vld [vmem:[%s5500_s0 + $0x358] sm:$0xf] }
 0x186   :  { %v3214_v8 = vor.u32 %v3641_v51, %v3213_v45  ;;  %v3707_v40 = vld [vmem:[%s5505_s5 + $0x38] sm:$0xff] }
 0x187   :  { %v4799_v28 = vadd.f32 %v1473_v41, %v1385_v44  ;;  %2111 = vmatpush.bf16.msra.mxu0 %v3707_v40  ;;  %v3544_v44 = vld [vmem:[%s5500_s0 + $0x68] sm:$0xf0] }
 0x18c   :  { %v1386_v55 = vpop.f32.mrf.mxu2 }
 0x18d   :  { %v4819_v60 = vpop.f32.mrf.mxu3  ;;  %v4828_v2 = vadd.f32 %v1386_v55, %v4543_v57  ;;  %v2801_v57 = vld [vmem:[%s5500_s0 + $0x18] sm:$0xf] }
 0x18e   :  { %v2802_v33 = vor.u32 %v3537_v17, %v2801_v57  ;;  %v2885_v57 = vld [vmem:[%s5500_s0 + $0xc0] sm:$0xf] }
 0x191   :  { %1428 = vmatmul.bf16.gmra.mxu2 %v3206_v4 }
 0x192   :  { %1517 = vmatmul.bf16.gmra.mxu3 %v3210_v43 }
 0x193   :  { %1606 = vmatmul.bf16.gmra.mxu0 %v3214_v8  ;;  %1695 = vmatmul.bf16.gmra.mxu1 %v3218_v42 }
 0x194   :  { %v1389_v12 = vpop.f32.mrf.mxu2 }
 0x195   :  { %v1478_v13 = vpop.f32.mrf.mxu3  ;;  %v1390_v3 = vadd.f32 %v1389_v12, %v4567_v23 }
 0x197   :  { %v4834_v14 = vadd.f32 %v1478_v13, %v1390_v3  ;;  %v3706_v13 = vld [vmem:[%s5505_s5 + $0x30] sm:$0xff] }
 0x198   :  { %2112 = vmatpush.bf16.msra.mxu0 %v3706_v13 }
 0x19c   :  { %v1391_v61 = vpop.f32.mrf.mxu2 }
 0x19d   :  { %v4842_v27 = vpop.f32.mrf.mxu3  ;;  %v4845_v26 = vadd.f32 %v1391_v61, %v4582_v46  ;;  %v2829_v46 = vld [vmem:[%s5500_s0 + $0x50] sm:$0xf] }
 0x19e   :  { %v2830_v38 = vor.u32 %v3544_v44, %v2829_v46  ;;  %v2913_v44 = vld [vmem:[%s5500_s0 + $0xf8] sm:$0xf] }
 0x1a1   :  { %3419 = vmatmul.msk.bf16.vlgmr.msra.gmra.mxu2 %vm1118_vm0, %v2802_v33 }
 0x1a4   :  { %v1394_v23 = vpop.f32.mrf.mxu2 }
 0x1a5   :  { %v1483_v31 = vpop.f32.mrf.mxu3  ;;  %v1395_v6 = vadd.f32 %v1394_v23, %v4318_v37  ;;  %v3693_v23 = vld [vmem:[%s5503_s3 + $0x8] sm:$0xff] }
 0x1a6   :  { %1912 = vmatpush.bf16.msra.mxu3 %v3693_v23 }
 0x1a7   :  { %v4852_v41 = vadd.f32 %v1483_v31, %v1395_v6 }
 0x1ac   :  { %v1396_v47 = vpop.f32.mrf.mxu2 }
 0x1ad   :  { %v4860_v15 = vpop.f32.mrf.mxu3  ;;  %v4863_v37 = vadd.f32 %v1396_v47, %v4348_v56  ;;  %v3551_v56 = vld [vmem:[%s5500_s0 + $0xa0] sm:$0xf0] }
 0x1ae   :  { %v2858_v42 = vor.u32 %v3551_v56, %v2857_v7  ;;  %v3705_v7 = vld [vmem:[%s5505_s5 + $0x28] sm:$0xff] }
 0x1af   :  { %2113 = vmatpush.bf16.msra.mxu0 %v3705_v7 }
 0x1b1   :  { %3420 = vmatmul.msk.bf16.gmra.mxu2 %vm1118_vm0, %v2830_v38 }
 0x1b4   :  { %v1399_v45 = vpop.f32.mrf.mxu2 }
 0x1b5   :  { %v1488_v51 = vpop.f32.mrf.mxu3  ;;  %v1400_v55 = vadd.f32 %v1399_v45, %v4354_v1 }
 0x1b7   :  { %v4870_v58 = vadd.f32 %v1488_v51, %v1400_v55 }
 0x1bc   :  { %v1401_v4 = vpop.f32.mrf.mxu2 }
 0x1bd   :  { %v4878_v43 = vpop.f32.mrf.mxu3  ;;  %v4881_v8 = vadd.f32 %v1401_v4, %v4384_v20  ;;  %v3558_v20 = vld [vmem:[%s5500_s0 + $0xd8] sm:$0xf0]  ;;  %v2941_v4 = vld [vmem:[%s5500_s0 + $0x130] sm:$0xf] }
 0x1be   :  { %v2886_v33 = vor.u32 %v3558_v20, %v2885_v57 }
 0x1c1   :  { %3421 = vmatmul.msk.bf16.gmra.mxu2 %vm1118_vm0, %v2858_v42 }
 0x1c4   :  { %v1404_v1 = vpop.f32.mrf.mxu2 }
 0x1c5   :  { %v1493_v11 = vpop.f32.mrf.mxu3  ;;  %v1405_v12 = vadd.f32 %v1404_v1, %v4390_v30 }
 0x1c7   :  { %v4888_v3 = vadd.f32 %v1493_v11, %v1405_v12  ;;  %v3692_v12 = vld [vmem:[%s5503_s3] sm:$0xff] }
 0x1c8   :  { %1913 = vmatpush.bf16.msra.mxu3 %v3692_v12  ;;  %v3025_v12 = vld [vmem:[%s5500_s0 + $0x1d8] sm:$0xf] }
 0x1cc   :  { %v1406_v17 = vpop.f32.mrf.mxu2 }
 0x1cd   :  { %v4896_v61 = vpop.f32.mrf.mxu3  ;;  %v4899_v30 = vadd.f32 %v1406_v17, %v4420_v52  ;;  %v3565_v52 = vld [vmem:[%s5500_s0 + $0x110] sm:$0xf0] }
 0x1ce   :  { %v2914_v45 = vor.u32 %v3565_v52, %v2913_v44 }
 0x1d1   :  { %3422 = vmatmul.msk.bf16.gmra.mxu2 %vm1118_vm0, %v2886_v33  ;;  %v2969_v33 = vld [vmem:[%s5500_s0 + $0x168] sm:$0xf] }
 0x1d4   :  { %v1409_v31 = vpop.f32.mrf.mxu2 }
 0x1d5   :  { %v1498_v6 = vpop.f32.mrf.mxu3  ;;  %v1410_v40 = vadd.f32 %v1409_v31, %v4426_v63 }
 0x1d7   :  { %v4906_v46 = vadd.f32 %v1498_v6, %v1410_v40 }
 0x1dc   :  { %v1411_v47 = vpop.f32.mrf.mxu2 }
 0x1dd   :  { %v4914_v38 = vpop.f32.mrf.mxu3  ;;  %v4917_v50 = vadd.f32 %v1411_v47, %v4456_v21  ;;  %v3572_v21 = vld [vmem:[%s5500_s0 + $0x148] sm:$0xf0] }
 0x1de   :  { %v2942_v11 = vor.u32 %v3572_v21, %v2941_v4 }
 0x1e1   :  { %3423 = vmatmul.msk.bf16.gmra.mxu2 %vm1118_vm0, %v2914_v45  ;;  %v3704_v45 = vld [vmem:[%s5505_s5 + $0x20] sm:$0xff] }
 0x1e2   :  { %2114 = vmatpush.bf16.msra.mxu0 %v3704_v45 }
 0x1e4   :  { %v1414_v63 = vpop.f32.mrf.mxu2 }
 0x1e5   :  { %v1503_v51 = vpop.f32.mrf.mxu3  ;;  %v1415_v55 = vadd.f32 %v1414_v63, %v4462_v34  ;;  %v2997_v63 = vld [vmem:[%s5500_s0 + $0x1a0] sm:$0xf] }
 0x1e7   :  { %v4924_v56 = vadd.f32 %v1503_v51, %v1415_v55 }
 0x1ec   :  { %v1416_v42 = vpop.f32.mrf.mxu2 }
 0x1ed   :  { %v4932_v1 = vpop.f32.mrf.mxu3  ;;  %v4935_v34 = vadd.f32 %v1416_v42, %v4492_v59  ;;  %v3579_v59 = vld [vmem:[%s5500_s0 + $0x180] sm:$0xf0] }
 0x1ee   :  { %v2970_v40 = vor.u32 %v3579_v59, %v2969_v33  ;;  %v3053_v59 = vld [vmem:[%s5500_s0 + $0x210] sm:$0xf] }
 0x1f1   :  { %3424 = vmatmul.msk.bf16.gmra.mxu2 %vm1118_vm0, %v2942_v11 }
 0x1f4   :  { %v1419_v13 = vpop.f32.mrf.mxu2 }
 0x1f5   :  { %v1508_v57 = vpop.f32.mrf.mxu3  ;;  %v1420_v20 = vadd.f32 %v1419_v13, %v4498_v9  ;;  %v3593_v13 = vld [vmem:[%s5500_s0 + $0x1f0] sm:$0xf0] }
 0x1f7   :  { %v4942_v17 = vadd.f32 %v1508_v57, %v1420_v20  ;;  %v3026_v20 = vor.u32 %v3593_v13, %v3025_v12 }
 0x1fc   :  { %v1421_v23 = vpop.f32.mrf.mxu2 }
 0x1fd   :  { %v4950_v31 = vpop.f32.mrf.mxu3  ;;  %v4953_v6 = vadd.f32 %v1421_v23, %v4528_v36  ;;  %v3586_v36 = vld [vmem:[%s5500_s0 + $0x1b8] sm:$0xf0]  ;;  %v3600_v23 = vld [vmem:[%s5500_s0 + $0x228] sm:$0xf0] }
 0x1fe   :  { %v2998_v7 = vor.u32 %v3586_v36, %v2997_v63 }
 0x201   :  { %3425 = vmatmul.msk.bf16.gmra.mxu2 %vm1118_vm0, %v2970_v40 }
 0x204   :  { %v1424_v9 = vpop.f32.mrf.mxu2 }
 0x205   :  { %v1513_v44 = vpop.f32.mrf.mxu3  ;;  %v1425_v52 = vadd.f32 %v1424_v9, %v4534_v49 }
 0x207   :  { %v4957_v47 = vadd.f32 %v1513_v44, %v1425_v52  ;;  %v3054_v44 = vor.u32 %v3600_v23, %v3053_v59  ;;  %v1552_v52 = vpop.f32.mrf.mxu0 }
 0x20c   :  { %v1426_v51 = vpop.f32.mrf.mxu2 }
 0x20d   :  { %v4968_v55 = vpop.f32.mrf.mxu3  ;;  %v4971_v49 = vadd.f32 %v1426_v51, %v4564_v16  ;;  %v3715_v51 = vld [vmem:[%s5507_s7 + $0x38] sm:$0xff] }
 0x20e   :  { %2316 = vmatpush.bf16.msra.mxu1 %v3715_v51 }
 0x211   :  { %3426 = vmatmul.msk.bf16.gmra.mxu2 %vm1118_vm0, %v2998_v7  ;;  %v1641_v7 = vpop.f32.mrf.mxu1 }
 0x214   :  { %v1429_v4 = vpop.f32.mrf.mxu2 }
 0x215   :  { %v1518_v21 = vpop.f32.mrf.mxu3  ;;  %v1430_v42 = vadd.f32 %v1429_v4, %v4573_v32  ;;  %v3703_v32 = vld [vmem:[%s5505_s5 + $0x18] sm:$0xff] }
 0x216   :  { %2115 = vmatpush.bf16.msra.mxu0 %v3703_v32 }
 0x217   :  { %v4975_v11 = vadd.f32 %v1518_v21, %v1430_v42  ;;  %v1554_v21 = vpop.f32.mrf.mxu0 }
 0x219   :  { %v1643_v12 = vpop.f32.mrf.mxu1 }
 0x21c   :  { %v1431_v57 = vpop.f32.mrf.mxu2 }
 0x21d   :  { %v4984_v16 = vadd.f32 %v1431_v57, %v4603_v5 }
 0x21f   :  { %v5011_v23 = vpop.f32.mrf.mxu0 }
 0x221   :  { %3427 = vmatmul.msk.bf16.gmra.mxu2 %vm1118_vm0, %v3026_v20 }
 0x224   :  { %v1710_v33 = vpop.f32.mrf.mxu2 }
 0x225   :  { %v1711_v5 = vadd.f32 %v1710_v33, %v4618_v29  ;;  %v3081_v29 = vld [vmem:[%s5500_s0 + $0x248] sm:$0xf] }
 0x227   :  { %v1790_v45 = vmax.f32 %v1711_v5, 0.0 }
 0x22c   :  { %v1712_v40 = vpop.f32.mrf.mxu2 }
 0x22d   :  { %v1713_v9 = vadd.f32 %v1712_v40, %v4633_v0  ;;  %v3607_v0 = vld [vmem:[%s5500_s0 + $0x260] sm:$0xf0]  ;;  %v5013_v40 = vpop.f32.mrf.mxu1 }
 0x22e   :  { %v3082_v20 = vor.u32 %v3607_v0, %v3081_v29 }
 0x22f   :  { %v1791_v63 = vmax.f32 %v1713_v9, 0.0  ;;  %v3614_v9 = vld [vmem:[%s5500_s0 + $0x298] sm:$0xf0] }
 0x231   :  { %v1822_v36 = vpack.c.bf16 %v1791_v63, %v1790_v45  ;;  %3428 = vmatmul.msk.bf16.gmra.mxu2 %vm1118_vm0, %v3054_v44  ;;  %v1559_v45 = vpop.f32.mrf.mxu0 }
 0x233   :  { %1914 = vmatmul.bf16.vlgmr.msra.gmra.mxu3 %v1822_v36 }
 0x234   :  { %v1715_v4 = vpop.f32.mrf.mxu2 }
 0x235   :  { %v1716_v42 = vadd.f32 %v1715_v4, %v4651_v19  ;;  %v3702_v19 = vld [vmem:[%s5505_s5 + $0x10] sm:$0xff]  ;;  %v1648_v0 = vpop.f32.mrf.mxu1 }
 0x236   :  { %2116 = vmatpush.bf16.msra.mxu0 %v3702_v19 }
 0x237   :  { %v1792_v33 = vmax.f32 %v1716_v42, 0.0 }
 0x23c   :  { %v1717_v13 = vpop.f32.mrf.mxu2 }
 0x23d   :  { %v1718_v57 = vadd.f32 %v1717_v13, %v4666_v53  ;;  %v3109_v53 = vld [vmem:[%s5500_s0 + $0x280] sm:$0xf]  ;;  %v3714_v13 = vld [vmem:[%s5507_s7 + $0x30] sm:$0xff] }
 0x23e   :  { %v3110_v51 = vor.u32 %v3614_v9, %v3109_v53  ;;  %2317 = vmatpush.bf16.msra.mxu1 %v3714_v13 }
 0x23f   :  { %v1793_v32 = vmax.f32 %v1718_v57, 0.0 }
 0x241   :  { %3429 = vmatmul.msk.bf16.gmra.mxu2 %vm1118_vm0, %v3082_v20  ;;  %v1823_v59 = vpack.c.bf16 %v1793_v32, %v1792_v33  ;;  %v1562_v20 = vpop.f32.mrf.mxu0  ;;  %v3621_v33 = vld [vmem:[%s5500_s0 + $0x2d0] sm:$0xf0] }
 0x243   :  { %1919 = vmatmul.bf16.gmra.mxu3 %v1823_v59 }
 0x244   :  { %v1720_v5 = vpop.f32.mrf.mxu2 }
 0x245   :  { %v1721_v44 = vadd.f32 %v1720_v5, %v4681_v25  ;;  %v5030_v25 = vpop.f32.mrf.mxu1 }
 0x247   :  { %v1794_v4 = vmax.f32 %v1721_v44, 0.0 }
 0x249   :  { %v1564_v44 = vpop.f32.mrf.mxu0 }
 0x24c   :  { %v1722_v63 = vpop.f32.mrf.mxu2 }
 0x24d   :  { %v1723_v36 = vadd.f32 %v1722_v63, %v4696_v39  ;;  %v3137_v39 = vld [vmem:[%s5500_s0 + $0x2b8] sm:$0xf] }
 0x24e   :  { %v3138_v19 = vor.u32 %v3621_v33, %v3137_v39 }
 0x24f   :  { %v1795_v29 = vmax.f32 %v1723_v36, 0.0  ;;  %v1466_v36 = vadd.f32 %v4752_v48, %v4761_v54  ;;  %v3628_v48 = vld [vmem:[%s5500_s0 + $0x308] sm:$0xf0] }
 0x251   :  { %3430 = vmatmul.msk.bf16.gmra.mxu2 %vm1118_vm0, %v3110_v51  ;;  %v1824_v42 = vpack.c.bf16 %v1795_v29, %v1794_v4  ;;  %v1653_v51 = vpop.f32.mrf.mxu1  ;;  %v1553_v29 = vadd.f32 %v1552_v52, %v4732_v35  ;;  %v5047_v13 = vpop.f32.mrf.mxu0 }
 0x253   :  { %1924 = vmatmul.bf16.gmra.mxu3 %v1824_v42  ;;  %v1555_v42 = vadd.f32 %v1554_v21, %v1466_v36 }
 0x254   :  { %v1725_v57 = vpop.f32.mrf.mxu2 }
 0x255   :  { %v1726_v32 = vadd.f32 %v1725_v57, %v4714_v62  ;;  %v3701_v62 = vld [vmem:[%s5505_s5 + $0x8] sm:$0xff]  ;;  %v3165_v57 = vld [vmem:[%s5500_s0 + $0x2f0] sm:$0xf]  ;;  %v1644_v54 = vadd.f32 %v1643_v12, %v1555_v42  ;;  %v3635_v42 = vld [vmem:[%s5500_s0 + $0x340] sm:$0xf0] }
 0x256   :  { %2117 = vmatpush.bf16.msra.mxu0 %v3701_v62  ;;  %v3166_v21 = vor.u32 %v3628_v48, %v3165_v57 }
 0x257   :  { %v1796_v53 = vmax.f32 %v1726_v32, 0.0 }
 0x259   :  { %v1656_v33 = vpop.f32.mrf.mxu1  ;;  %v1569_v12 = vpop.f32.mrf.mxu0 }
 0x25c   :  { %v1727_v59 = vpop.f32.mrf.mxu2 }
 0x25d   :  { %v1728_v5 = vadd.f32 %v1727_v59, %v4729_v24  ;;  %v1642_v24 = vadd.f32 %v1641_v7, %v1553_v29  ;;  %v3193_v29 = vld [vmem:[%s5500_s0 + $0x328] sm:$0xf] }
 0x25e   :  { %v3194_v57 = vor.u32 %v3635_v42, %v3193_v29  ;;  %v1568_v29 = vadd.f32 %v5047_v13, %v4834_v14 }
 0x25f   :  { %v1797_v9 = vmax.f32 %v1728_v5, 0.0  ;;  %v3713_v5 = vld [vmem:[%s5507_s7 + $0x28] sm:$0xff] }
 0x260   :  { %2318 = vmatpush.bf16.msra.mxu1 %v3713_v5 }
 0x261   :  { %3431 = vmatmul.msk.bf16.gmra.mxu2 %vm1118_vm0, %v3138_v19  ;;  %v1825_v63 = vpack.c.bf16 %v1797_v9, %v1796_v53  ;;  %v1471_v19 = vadd.f32 %v4787_v18, %v4796_v22  ;;  %v1558_v9 = vadd.f32 %v5011_v23, %v4767_v10  ;;  %v1658_v36 = vpop.f32.mrf.mxu1  ;;  %v1572_v48 = vpop.f32.mrf.mxu0 }
 0x263   :  { %1929 = vmatmul.bf16.gmra.mxu3 %v1825_v63  ;;  %v1560_v63 = vadd.f32 %v1559_v45, %v1471_v19  ;;  %v1476_v45 = vadd.f32 %v4819_v60, %v4828_v2  ;;  %v3642_v60 = vld [vmem:[%s5500_s0 + $0x378] sm:$0xf0] }
 0x264   :  { %v1730_v4 = vpop.f32.mrf.mxu2 }
 0x265   :  { %v1731_v39 = vadd.f32 %v1730_v4, %v1642_v24  ;;  %v1647_v4 = vadd.f32 %v5013_v40, %v1558_v9  ;;  %v1649_v18 = vadd.f32 %v1648_v0, %v1560_v63  ;;  %v3700_v0 = vld [vmem:[%s5505_s5] sm:$0xff] }
 0x266   :  { %2118 = vmatpush.bf16.msra.mxu0 %v3700_v0 }
 0x267   :  { %v1798_v32 = vmax.f32 %v1731_v39, 0.0 }
 0x269   :  { %v1661_v40 = vpop.f32.mrf.mxu1 }
 0x26c   :  { %v1732_v35 = vpop.f32.mrf.mxu2 }
 0x26d   :  { %v1733_v52 = vadd.f32 %v1732_v35, %v1644_v54  ;;  %v1563_v35 = vadd.f32 %v1562_v20, %v4799_v28 }
 0x26f   :  { %v1799_v59 = vmax.f32 %v1733_v52, 0.0  ;;  %v1565_v52 = vadd.f32 %v1564_v44, %v1476_v45 }
 0x271   :  { %v1826_v7 = vpack.c.bf16 %v1799_v59, %v1798_v32  ;;  %3432 = vmatmul.msk.bf16.gmra.mxu2 %vm1118_vm0, %v3166_v21  ;;  %v1574_v21 = vpop.f32.mrf.mxu0  ;;  %v1652_v32 = vadd.f32 %v5030_v25, %v1563_v35  ;;  %v3221_v59 = vld [vmem:[%s5500_s0 + $0x360] sm:$0xf]  ;;  %v1654_v2 = vadd.f32 %v1653_v51, %v1565_v52  ;;  %v1663_v28 = vpop.f32.mrf.mxu1  ;;  %v1573_v52 = vadd.f32 %v1572_v48, %v4852_v41 }
 0x272   :  { %v3222_v5 = vor.u32 %v3642_v60, %v3221_v59  ;;  %v3712_v25 = vld [vmem:[%s5507_s7 + $0x20] sm:$0xff]  ;;  %v5095_v60 = vpop.f32.mrf.mxu3  ;;  %v1491_v41 = vadd.f32 %v4878_v43, %v4881_v8 }
 0x273   :  { %1934 = vmatmul.bf16.gmra.mxu3 %v1826_v7  ;;  %2319 = vmatpush.bf16.msra.mxu1 %v3712_v25 }
 0x274   :  { %v1735_v53 = vpop.f32.mrf.mxu2 }
 0x275   :  { %v1736_v22 = vadd.f32 %v1735_v53, %v1647_v4  ;;  %v1481_v4 = vadd.f32 %v4842_v27, %v4845_v26  ;;  %v1486_v27 = vadd.f32 %v4860_v15, %v4863_v37  ;;  %v3711_v15 = vld [vmem:[%s5507_s7 + $0x18] sm:$0xff] }
 0x277   :  { %v1800_v54 = vmax.f32 %v1736_v22, 0.0  ;;  %v1657_v22 = vadd.f32 %v1656_v33, %v1568_v29  ;;  %v1575_v13 = vadd.f32 %v1574_v21, %v1486_v27  ;;  %2320 = vmatpush.bf16.msra.mxu1 %v3711_v15 }
 0x279   :  { %v1577_v63 = vpop.f32.mrf.mxu0  ;;  %v1666_v42 = vpop.f32.mrf.mxu1 }
 0x27c   :  { %v1737_v62 = vpop.f32.mrf.mxu2 }
 0x27d   :  { %v1738_v24 = vadd.f32 %v1737_v62, %v1649_v18  ;;  %v1570_v18 = vadd.f32 %v1569_v12, %v1481_v4  ;;  %v1662_v12 = vadd.f32 %v1661_v40, %v1573_v52  ;;  %v1578_v40 = vadd.f32 %v1577_v63, %v4870_v58 }
 0x27f   :  { %v1801_v10 = vmax.f32 %v1738_v24, 0.0  ;;  %v1659_v62 = vadd.f32 %v1658_v36, %v1570_v18  ;;  %v1664_v36 = vadd.f32 %v1663_v28, %v1575_v13 }
 0x281   :  { %v1827_v23 = vpack.c.bf16 %v1801_v10, %v1800_v54  ;;  %3433 = vmatmul.msk.bf16.gmra.mxu2 %vm1118_vm0, %v3194_v57  ;;  %v1579_v57 = vpop.f32.mrf.mxu0 }
 0x282   :  { %v1580_v28 = vadd.f32 %v1579_v57, %v1491_v41 }
 0x283   :  { %1939 = vmatmul.bf16.gmra.mxu3 %v1827_v23 }
 0x284   :  { %v1740_v39 = vpop.f32.mrf.mxu2 }
 0x285   :  { %v1741_v7 = vadd.f32 %v1740_v39, %v1652_v32  ;;  %v1668_v39 = vpop.f32.mrf.mxu1 }
 0x287   :  { %v1802_v19 = vmax.f32 %v1741_v7, 0.0 }
 0x289   :  { %v1582_v14 = vpop.f32.mrf.mxu0 }
 0x28c   :  { %v1742_v20 = vpop.f32.mrf.mxu2 }
 0x28d   :  { %v1743_v44 = vadd.f32 %v1742_v20, %v1654_v2  ;;  %v1671_v33 = vpop.f32.mrf.mxu1 }
 0x28f   :  { %v1803_v53 = vmax.f32 %v1743_v44, 0.0 }
 0x291   :  { %v1828_v9 = vpack.c.bf16 %v1803_v53, %v1802_v19  ;;  %3434 = vmatmul.msk.bf16.gmra.mxu2 %vm1118_vm0, %v3222_v5  ;;  %v1584_v20 = vpop.f32.mrf.mxu0  ;;  %v1667_v5 = vadd.f32 %v1666_v42, %v1578_v40  ;;  %v5106_v19 = vld [vmem:[%s5504_s4] ss:$0 sm:$0xff] }
 0x293   :  { %1944 = vmatmul.bf16.gmra.mxu3 %v1828_v9  ;;  %v1669_v9 = vadd.f32 %v1668_v39, %v1580_v28 }
 0x294   :  { %v1745_v51 = vpop.f32.mrf.mxu2 }
 0x295   :  { %v1746_v24 = vadd.f32 %v1745_v51, %v1657_v22  ;;  %v1673_v37 = vpop.f32.mrf.mxu1 }
 0x297   :  { %v1804_v23 = vmax.f32 %v1746_v24, 0.0  ;;  %v1496_v24 = vadd.f32 %v4896_v61, %v4899_v30 }
 0x299   :  { %v1587_v53 = vpop.f32.mrf.mxu0  ;;  %v1585_v39 = vadd.f32 %v1584_v20, %v1496_v24  ;;  %v1501_v20 = vadd.f32 %v4914_v38, %v4917_v50 }
 0x29a   :  { %v1588_v41 = vadd.f32 %v1587_v53, %v4906_v46 }
 0x29c   :  { %v1747_v54 = vpop.f32.mrf.mxu2 }
 0x29d   :  { %v1748_v10 = vadd.f32 %v1747_v54, %v1659_v62  ;;  %v1676_v51 = vpop.f32.mrf.mxu1 }
 0x29f   :  { %v1805_v45 = vmax.f32 %v1748_v10, 0.0 }
 0x2a1   :  { %v1829_v35 = vpack.c.bf16 %v1805_v45, %v1804_v23  ;;  %v1589_v54 = vpop.f32.mrf.mxu0  ;;  %v1583_v23 = vadd.f32 %v1582_v14, %v4888_v3  ;;  %v3710_v14 = vld [vmem:[%s5507_s7 + $0x10] sm:$0xff] }
 0x2a2   :  { %2321 = vmatpush.bf16.msra.mxu1 %v3710_v14 }
 0x2a3   :  { %1949 = vmatmul.bf16.gmra.mxu3 %v1829_v35  ;;  %v1672_v27 = vadd.f32 %v1671_v33, %v1583_v23 }
 0x2a4   :  { %v1750_v26 = vpop.f32.mrf.mxu2 }
 0x2a5   :  { %v1751_v0 = vadd.f32 %v1750_v26, %v1662_v12  ;;  %v1678_v35 = vpop.f32.mrf.mxu1  ;;  %v1674_v26 = vadd.f32 %v1673_v37, %v1585_v39 }
 0x2a7   :  { %v1806_v2 = vmax.f32 %v1751_v0, 0.0 }
 0x2a9   :  { %v1592_v0 = vpop.f32.mrf.mxu0 }
 0x2ac   :  { %v1752_v32 = vpop.f32.mrf.mxu2 }
 0x2ad   :  { %v1753_v59 = vadd.f32 %v1752_v32, %v1664_v36  ;;  %v1681_v33 = vpop.f32.mrf.mxu1 }
 0x2af   :  { %v1807_v7 = vmax.f32 %v1753_v59, 0.0 }
 0x2b1   :  { %v1830_v44 = vpack.c.bf16 %v1807_v7, %v1806_v2  ;;  %v1594_v40 = vpop.f32.mrf.mxu0 }
 0x2b3   :  { %1954 = vmatmul.bf16.gmra.mxu3 %v1830_v44 }
 0x2b4   :  { %v1755_v48 = vpop.f32.mrf.mxu2 }
 0x2b5   :  { %v1756_v25 = vadd.f32 %v1755_v48, %v1667_v5  ;;  %v1590_v48 = vadd.f32 %v1589_v54, %v1501_v20 }
 0x2b6   :  { %v1915_v21 = vpop.f32.mrf.mxu3 }
 0x2b7   :  { %v1916_v43 = vadd.f32 %v5106_v19, %v1915_v21  ;;  %v1808_v18 = vmax.f32 %v1756_v25, 0.0  ;;  %v1677_v21 = vadd.f32 %v1676_v51, %v1588_v41  ;;  %v1679_v28 = vadd.f32 %v1678_v35, %v1590_v48 }
 0x2b9   :  { %v1995_v63 = vmax.f32 %v1916_v43, 0.0  ;;  %v1597_v53 = vpop.f32.mrf.mxu0 }
 0x2bc   :  { %v1757_v4 = vpop.f32.mrf.mxu2 }
 0x2bd   :  { %v1758_v8 = vadd.f32 %v1757_v4, %v1669_v9  ;;  %v1683_v9 = vpop.f32.mrf.mxu1 }
 0x2be   :  { %v1917_v29 = vpop.f32.mrf.mxu3 }
 0x2bf   :  { %v1809_v22 = vmax.f32 %v1758_v8, 0.0  ;;  %v1918_v58 = vadd.f32 %v5106_v19, %v1917_v29 }
 0x2c1   :  { %v1831_v42 = vpack.c.bf16 %v1809_v22, %v1808_v18  ;;  %v1996_v62 = vmax.f32 %v1918_v58, 0.0  ;;  %v1506_v58 = vadd.f32 %v4932_v1, %v4935_v34 }
 0x2c3   :  { %v2027_v57 = vpack.c.bf16 %v1996_v62, %v1995_v63  ;;  %1959 = vmatmul.bf16.gmra.mxu3 %v1831_v42  ;;  %v1593_v42 = vadd.f32 %v1592_v0, %v4924_v56  ;;  %v1511_v0 = vadd.f32 %v4950_v31, %v4953_v6 }
 0x2c4   :  { %v1760_v10 = vpop.f32.mrf.mxu2 }
 0x2c5   :  { %2119 = vmatmul.bf16.vlgmr.msra.gmra.mxu0 %v2027_v57  ;;  %v1761_v52 = vadd.f32 %v1760_v10, %v1672_v27  ;;  %v1686_v62 = vpop.f32.mrf.mxu1  ;;  %v1595_v57 = vadd.f32 %v1594_v40, %v1506_v58  ;;  %v1682_v54 = vadd.f32 %v1681_v33, %v1593_v42 }
 0x2c6   :  { %v1920_v45 = vpop.f32.mrf.mxu3 }
 0x2c7   :  { %v1921_v12 = vadd.f32 %v5106_v19, %v1920_v45  ;;  %v1810_v61 = vmax.f32 %v1761_v52, 0.0  ;;  %v1684_v10 = vadd.f32 %v1683_v9, %v1595_v57  ;;  %v1599_v45 = vpop.f32.mrf.mxu0  ;;  %v1516_v9 = vadd.f32 %v4968_v55, %v4971_v49 }
 0x2c9   :  { %v1997_v2 = vmax.f32 %v1921_v12, 0.0 }
 0x2cc   :  { %v1762_v13 = vpop.f32.mrf.mxu2 }
 0x2cd   :  { %v1763_v36 = vadd.f32 %v1762_v13, %v1674_v26  ;;  %v1688_v13 = vpop.f32.mrf.mxu1 }
 0x2ce   :  { %v1922_v32 = vpop.f32.mrf.mxu3 }
 0x2cf   :  { %v1811_v30 = vmax.f32 %v1763_v36, 0.0  ;;  %v1923_v59 = vadd.f32 %v5106_v19, %v1922_v32 }
 0x2d1   :  { %v1832_v7 = vpack.c.bf16 %v1811_v30, %v1810_v61  ;;  %v1998_v3 = vmax.f32 %v1923_v59, 0.0  ;;  %v3709_v61 = vld [vmem:[%s5507_s7 + $0x8] sm:$0xff]  ;;  %v1598_v59 = vadd.f32 %v1597_v53, %v4942_v17 }
 0x2d2   :  { %2322 = vmatpush.bf16.msra.mxu1 %v3709_v61 }
 0x2d3   :  { %1964 = vmatmul.bf16.gmra.mxu3 %v1832_v7  ;;  %v2028_v44 = vpack.c.bf16 %v1998_v3, %v1997_v2  ;;  %v1602_v2 = vpop.f32.mrf.mxu0  ;;  %v1600_v3 = vadd.f32 %v1599_v45, %v1511_v0  ;;  %v1687_v14 = vadd.f32 %v1686_v62, %v1598_v59 }
 0x2d4   :  { %v1765_v15 = vpop.f32.mrf.mxu2 }
 0x2d5   :  { %2124 = vmatmul.bf16.gmra.mxu0 %v2028_v44  ;;  %v1766_v5 = vadd.f32 %v1765_v15, %v1677_v21  ;;  %v1691_v33 = vpop.f32.mrf.mxu1  ;;  %v1689_v20 = vadd.f32 %v1688_v13, %v1600_v3 }
 0x2d6   :  { %v1925_v37 = vpop.f32.mrf.mxu3 }
 0x2d7   :  { %v1926_v4 = vadd.f32 %v5106_v19, %v1925_v37  ;;  %v1812_v38 = vmax.f32 %v1766_v5, 0.0 }
 0x2d9   :  { %v1999_v18 = vmax.f32 %v1926_v4, 0.0 }
 0x2db   :  { %v1604_v21 = vpop.f32.mrf.mxu0 }
 0x2dc   :  { %v1767_v25 = vpop.f32.mrf.mxu2 }
 0x2dd   :  { %v1768_v43 = vadd.f32 %v1767_v25, %v1679_v28  ;;  %v1693_v4 = vpop.f32.mrf.mxu1 }
 0x2de   :  { %v1927_v8 = vpop.f32.mrf.mxu3 }
 0x2df   :  { %v1813_v50 = vmax.f32 %v1768_v43, 0.0  ;;  %v1928_v29 = vadd.f32 %v5106_v19, %v1927_v8  ;;  %v1603_v8 = vadd.f32 %v1602_v2, %v4957_v47 }
 0x2e1   :  { %v1833_v22 = vpack.c.bf16 %v1813_v50, %v1812_v38  ;;  %v2000_v46 = vmax.f32 %v1928_v29, 0.0  ;;  %v1605_v50 = vadd.f32 %v1604_v21, %v1516_v9  ;;  %v1692_v29 = vadd.f32 %v1691_v33, %v1603_v8 }
 0x2e3   :  { %1969 = vmatmul.bf16.gmra.mxu3 %v1833_v22  ;;  %v2029_v51 = vpack.c.bf16 %v2000_v46, %v1999_v18  ;;  %v1607_v18 = vpop.f32.mrf.mxu0  ;;  %v1694_v22 = vadd.f32 %v1693_v4, %v1605_v50 }
 0x2e4   :  { %v1770_v63 = vpop.f32.mrf.mxu2 }
 0x2e5   :  { %2129 = vmatmul.bf16.gmra.mxu0 %v2029_v51  ;;  %v1771_v23 = vadd.f32 %v1770_v63, %v1682_v54  ;;  %v1696_v63 = vpop.f32.mrf.mxu1  ;;  %v1521_v54 = vadd.f32 %v5095_v60, %v4984_v16 }
 0x2e6   :  { %v1930_v24 = vpop.f32.mrf.mxu3 }
 0x2e7   :  { %v1931_v35 = vadd.f32 %v5106_v19, %v1930_v24  ;;  %v1814_v52 = vmax.f32 %v1771_v23, 0.0  ;;  %v3708_v23 = vld [vmem:[%s5507_s7] sm:$0xff] }
 0x2e8   :  { %2323 = vmatpush.bf16.msra.mxu1 %v3708_v23 }
 0x2e9   :  { %v2001_v12 = vmax.f32 %v1931_v35, 0.0  ;;  %v1608_v35 = vadd.f32 %v1607_v18, %v4975_v11 }
 0x2eb   :  { %v1609_v45 = vpop.f32.mrf.mxu0 }
 0x2ec   :  { %v1772_v39 = vpop.f32.mrf.mxu2 }
 0x2ed   :  { %v1773_v27 = vadd.f32 %v1772_v39, %v1684_v10 }
 0x2ee   :  { %v1932_v26 = vpop.f32.mrf.mxu3 }
 0x2ef   :  { %v1815_v1 = vmax.f32 %v1773_v27, 0.0  ;;  %v1933_v34 = vadd.f32 %v5106_v19, %v1932_v26  ;;  %v1610_v26 = vadd.f32 %v1609_v45, %v1521_v54 }
 0x2f1   :  { %v1834_v56 = vpack.c.bf16 %v1815_v1, %v1814_v52  ;;  %v2002_v36 = vmax.f32 %v1933_v34, 0.0  ;;  %v1698_v52 = vpop.f32.mrf.mxu1  ;;  %v1697_v1 = vadd.f32 %v1696_v63, %v1608_v35 }
 0x2f2   :  { %v1699_v34 = vadd.f32 %v1698_v52, %v1610_v26 }
 0x2f3   :  { %1974 = vmatmul.bf16.gmra.mxu3 %v1834_v56  ;;  %v2030_v32 = vpack.c.bf16 %v2002_v36, %v2001_v12 }
 0x2f4   :  { %v1775_v30 = vpop.f32.mrf.mxu2 }
 0x2f5   :  { %2134 = vmatmul.bf16.gmra.mxu0 %v2030_v32  ;;  %v1776_v44 = vadd.f32 %v1775_v30, %v1687_v14 }
 0x2f6   :  { %v1935_v7 = vpop.f32.mrf.mxu3 }
 0x2f7   :  { %v1936_v31 = vadd.f32 %v5106_v19, %v1935_v7  ;;  %v1816_v37 = vmax.f32 %v1776_v44, 0.0 }
 0x2f9   :  { %v2003_v17 = vmax.f32 %v1936_v31, 0.0 }
 0x2fc   :  { %v1777_v15 = vpop.f32.mrf.mxu2 }
 0x2fd   :  { %v1778_v6 = vadd.f32 %v1777_v15, %v1689_v20 }
 0x2fe   :  { %v1937_v41 = vpop.f32.mrf.mxu3 }
 0x2ff   :  { %v1817_v48 = vmax.f32 %v1778_v6, 0.0  ;;  %v1938_v40 = vadd.f32 %v5106_v19, %v1937_v41 }
 0x301   :  { %v1835_v28 = vpack.c.bf16 %v1817_v48, %v1816_v37  ;;  %v2004_v5 = vmax.f32 %v1938_v40, 0.0 }
 0x303   :  { %v2031_v25 = vpack.c.bf16 %v2004_v5, %v2003_v17  ;;  %1979 = vmatmul.bf16.gmra.mxu3 %v1835_v28  ;;  %v5156_v17 = vld [vmem:[%s5506_s6] ss:$0 sm:$0xff] }
 0x304   :  { %v1780_v43 = vpop.f32.mrf.mxu2 }
 0x305   :  { %2139 = vmatmul.bf16.gmra.mxu0 %v2031_v25  ;;  %v1781_v46 = vadd.f32 %v1780_v43, %v1692_v29 }
 0x306   :  { %v1940_v38 = vpop.f32.mrf.mxu3 }
 0x307   :  { %v1941_v58 = vadd.f32 %v5106_v19, %v1940_v38  ;;  %v1818_v55 = vmax.f32 %v1781_v46, 0.0 }
 0x309   :  { %v2005_v24 = vmax.f32 %v1941_v58, 0.0 }
 0x30c   :  { %v1782_v53 = vpop.f32.mrf.mxu2 }
 0x30d   :  { %v1783_v51 = vadd.f32 %v1782_v53, %v1694_v22 }
 0x30e   :  { %v1942_v42 = vpop.f32.mrf.mxu3 }
 0x30f   :  { %v1819_v49 = vmax.f32 %v1783_v51, 0.0  ;;  %v1943_v62 = vadd.f32 %v5106_v19, %v1942_v42 }
 0x311   :  { %v1836_v57 = vpack.c.bf16 %v1819_v49, %v1818_v55  ;;  %v2006_v47 = vmax.f32 %v1943_v62, 0.0 }
 0x313   :  { %v2032_v10 = vpack.c.bf16 %v2006_v47, %v2005_v24  ;;  %1984 = vmatmul.bf16.gmra.mxu3 %v1836_v57 }
 0x314   :  { %v1785_v39 = vpop.f32.mrf.mxu2 }
 0x315   :  { %2144 = vmatmul.bf16.gmra.mxu0 %v2032_v10  ;;  %v1786_v13 = vadd.f32 %v1785_v39, %v1697_v1 }
 0x316   :  { %v1945_v27 = vpop.f32.mrf.mxu3 }
 0x317   :  { %v1946_v16 = vadd.f32 %v5106_v19, %v1945_v27  ;;  %v1820_v36 = vmax.f32 %v1786_v13, 0.0 }
 0x319   :  { %v2007_v61 = vmax.f32 %v1946_v16, 0.0 }
 0x31c   :  { %v1787_v12 = vpop.f32.mrf.mxu2 }
 0x31d   :  { %v1788_v60 = vadd.f32 %v1787_v12, %v1699_v34 }
 0x31e   :  { %v1947_v56 = vpop.f32.mrf.mxu3 }
 0x31f   :  { %v1821_v0 = vmax.f32 %v1788_v60, 0.0  ;;  %v1948_v32 = vadd.f32 %v5106_v19, %v1947_v56 }
 0x321   :  { %v1837_v30 = vpack.c.bf16 %v1821_v0, %v1820_v36  ;;  %v2008_v11 = vmax.f32 %v1948_v32, 0.0 }
 0x323   :  { %v2033_v59 = vpack.c.bf16 %v2008_v11, %v2007_v61  ;;  %1989 = vmatmul.bf16.gmra.mxu3 %v1837_v30 }
 0x325   :  { %2149 = vmatmul.bf16.gmra.mxu0 %v2033_v59 }
 0x326   :  { %v1950_v2 = vpop.f32.mrf.mxu3 }
 0x327   :  { %v1951_v7 = vadd.f32 %v5106_v19, %v1950_v2 }
 0x329   :  { %v2009_v33 = vmax.f32 %v1951_v7, 0.0 }
 0x32e   :  { %v1952_v3 = vpop.f32.mrf.mxu3 }
 0x32f   :  { %v1953_v14 = vadd.f32 %v5106_v19, %v1952_v3 }
 0x331   :  { %v2010_v20 = vmax.f32 %v1953_v14, 0.0 }
 0x333   :  { %v2034_v44 = vpack.c.bf16 %v2010_v20, %v2009_v33 }
 0x335   :  { %2154 = vmatmul.bf16.gmra.mxu0 %v2034_v44 }
 0x336   :  { %v1955_v15 = vpop.f32.mrf.mxu3 }
 0x337   :  { %v1956_v31 = vadd.f32 %v5106_v19, %v1955_v15 }
 0x339   :  { %v2011_v37 = vmax.f32 %v1956_v31, 0.0 }
 0x33e   :  { %v1957_v6 = vpop.f32.mrf.mxu3 }
 0x33f   :  { %v1958_v41 = vadd.f32 %v5106_v19, %v1957_v6 }
 0x341   :  { %v2012_v48 = vmax.f32 %v1958_v41, 0.0 }
 0x342   :  { %v2120_v40 = vpop.f32.mrf.mxu0 }
 0x343   :  { %v2035_v21 = vpack.c.bf16 %v2012_v48, %v2011_v37  ;;  %v2121_v5 = vadd.f32 %v5156_v17, %v2120_v40 }
 0x345   :  { %2159 = vmatmul.bf16.gmra.mxu0 %v2035_v21  ;;  %v2200_v4 = vmax.f32 %v2121_v5, 0.0 }
 0x346   :  { %v1960_v28 = vpop.f32.mrf.mxu3 }
 0x347   :  { %v1961_v43 = vadd.f32 %v5106_v19, %v1960_v28 }
 0x349   :  { %v2013_v18 = vmax.f32 %v1961_v43, 0.0 }
 0x34a   :  { %v2122_v9 = vpop.f32.mrf.mxu0 }
 0x34b   :  { %v2123_v25 = vadd.f32 %v5156_v17, %v2122_v9 }
 0x34d   :  { %v2201_v8 = vmax.f32 %v2123_v25, 0.0 }
 0x34e   :  { %v1962_v38 = vpop.f32.mrf.mxu3 }
 0x34f   :  { %v2232_v50 = vpack.c.bf16 %v2201_v8, %v2200_v4  ;;  %v1963_v29 = vadd.f32 %v5106_v19, %v1962_v38 }
 0x351   :  { %v2014_v22 = vmax.f32 %v1963_v29, 0.0  ;;  %2324 = vmatmul.bf16.vlgmr.msra.gmra.mxu1 %v2232_v50 }
 0x352   :  { %v2125_v46 = vpop.f32.mrf.mxu0 }
 0x353   :  { %v2036_v53 = vpack.c.bf16 %v2014_v22, %v2013_v18  ;;  %v2126_v51 = vadd.f32 %v5156_v17, %v2125_v46 }
 0x355   :  { %2164 = vmatmul.bf16.gmra.mxu0 %v2036_v53  ;;  %v2202_v55 = vmax.f32 %v2126_v51, 0.0 }
 0x356   :  { %v1965_v58 = vpop.f32.mrf.mxu3 }
 0x357   :  { %v1966_v49 = vadd.f32 %v5106_v19, %v1965_v58 }
 0x359   :  { %v2015_v54 = vmax.f32 %v1966_v49, 0.0 }
 0x35a   :  { %v2127_v63 = vpop.f32.mrf.mxu0 }
 0x35b   :  { %v2128_v42 = vadd.f32 %v5156_v17, %v2127_v63 }
 0x35d   :  { %v2203_v62 = vmax.f32 %v2128_v42, 0.0 }
 0x35e   :  { %v1967_v24 = vpop.f32.mrf.mxu3 }
 0x35f   :  { %v1968_v57 = vadd.f32 %v5106_v19, %v1967_v24  ;;  %v2233_v47 = vpack.c.bf16 %v2203_v62, %v2202_v55 }
 0x361   :  { %v2016_v10 = vmax.f32 %v1968_v57, 0.0  ;;  %2329 = vmatmul.bf16.gmra.mxu1 %v2233_v47 }
 0x362   :  { %v2130_v23 = vpop.f32.mrf.mxu0 }
 0x363   :  { %v2037_v45 = vpack.c.bf16 %v2016_v10, %v2015_v54  ;;  %v2131_v35 = vadd.f32 %v5156_v17, %v2130_v23 }
 0x365   :  { %2169 = vmatmul.bf16.gmra.mxu0 %v2037_v45  ;;  %v2204_v52 = vmax.f32 %v2131_v35, 0.0 }
 0x366   :  { %v1970_v39 = vpop.f32.mrf.mxu3 }
 0x367   :  { %v1971_v1 = vadd.f32 %v5106_v19, %v1970_v39 }
 0x369   :  { %v2017_v60 = vmax.f32 %v1971_v1, 0.0 }
 0x36a   :  { %v2132_v27 = vpop.f32.mrf.mxu0 }
 0x36b   :  { %v2133_v26 = vadd.f32 %v5156_v17, %v2132_v27 }
 0x36d   :  { %v2205_v34 = vmax.f32 %v2133_v26, 0.0 }
 0x36e   :  { %v1972_v13 = vpop.f32.mrf.mxu3 }
 0x36f   :  { %v1973_v12 = vadd.f32 %v5106_v19, %v1972_v13  ;;  %v2234_v16 = vpack.c.bf16 %v2205_v34, %v2204_v52 }
 0x371   :  { %v2018_v56 = vmax.f32 %v1973_v12, 0.0  ;;  %2334 = vmatmul.bf16.gmra.mxu1 %v2234_v16 }
 0x372   :  { %v2135_v36 = vpop.f32.mrf.mxu0 }
 0x373   :  { %v2038_v0 = vpack.c.bf16 %v2018_v56, %v2017_v60  ;;  %v2136_v61 = vadd.f32 %v5156_v17, %v2135_v36 }
 0x375   :  { %2174 = vmatmul.bf16.gmra.mxu0 %v2038_v0  ;;  %v2206_v59 = vmax.f32 %v2136_v61, 0.0 }
 0x376   :  { %v1975_v32 = vpop.f32.mrf.mxu3 }
 0x377   :  { %v1976_v2 = vadd.f32 %v5106_v19, %v1975_v32 }
 0x379   :  { %v2019_v20 = vmax.f32 %v1976_v2, 0.0 }
 0x37a   :  { %v2137_v30 = vpop.f32.mrf.mxu0 }
 0x37b   :  { %v2138_v11 = vadd.f32 %v5156_v17, %v2137_v30 }
 0x37d   :  { %v2207_v7 = vmax.f32 %v2138_v11, 0.0  ;;  %v5193_v11 = vld [vmem:[%s5508_s8] ss:$0 sm:$0xff]  ;;  %s3893_s8 = smov [#allocation2]  }
 0x37e   :  { %v1977_v3 = vpop.f32.mrf.mxu3  ;;  %s2761_s24 = sshll.u32 %s3893_s8, 4  ;;  %s2762_s24 = int_to_ptr.vmem [resolvable:$true] %s2761_s24 }
 0x37f   :  { %v1978_v14 = vadd.f32 %v5106_v19, %v1977_v3  ;;  %v2235_v33 = vpack.c.bf16 %v2207_v7, %v2206_v59 }
 0x381   :  { %v2020_v44 = vmax.f32 %v1978_v14, 0.0  ;;  %2339 = vmatmul.bf16.gmra.mxu1 %v2235_v33 }
 0x382   :  { %v2140_v15 = vpop.f32.mrf.mxu0 }
 0x383   :  { %v2039_v31 = vpack.c.bf16 %v2020_v44, %v2019_v20  ;;  %v2141_v41 = vadd.f32 %v5156_v17, %v2140_v15 }
 0x385   :  { %2179 = vmatmul.bf16.gmra.mxu0 %v2039_v31  ;;  %v2208_v40 = vmax.f32 %v2141_v41, 0.0 }
 0x386   :  { %v1980_v6 = vpop.f32.mrf.mxu3 }
 0x387   :  { %v1981_v21 = vadd.f32 %v5106_v19, %v1980_v6 }
 0x389   :  { %v2021_v4 = vmax.f32 %v1981_v21, 0.0 }
 0x38a   :  { %v2142_v37 = vpop.f32.mrf.mxu0 }
 0x38b   :  { %v2143_v48 = vadd.f32 %v5156_v17, %v2142_v37 }
 0x38d   :  { %v2209_v28 = vmax.f32 %v2143_v48, 0.0 }
 0x38e   :  { %v1982_v5 = vpop.f32.mrf.mxu3 }
 0x38f   :  { %v2236_v9 = vpack.c.bf16 %v2209_v28, %v2208_v40  ;;  %v1983_v25 = vadd.f32 %v5106_v19, %v1982_v5 }
 0x391   :  { %v2022_v43 = vmax.f32 %v1983_v25, 0.0  ;;  %2344 = vmatmul.bf16.gmra.mxu1 %v2236_v9 }
 0x392   :  { %v2145_v8 = vpop.f32.mrf.mxu0 }
 0x393   :  { %v2040_v38 = vpack.c.bf16 %v2022_v43, %v2021_v4  ;;  %v2146_v29 = vadd.f32 %v5156_v17, %v2145_v8 }
 0x395   :  { %2184 = vmatmul.bf16.gmra.mxu0 %v2040_v38  ;;  %v2210_v46 = vmax.f32 %v2146_v29, 0.0 }
 0x396   :  { %v1985_v50 = vpop.f32.mrf.mxu3 }
 0x397   :  { %v1986_v53 = vadd.f32 %v5106_v19, %v1985_v50 }
 0x399   :  { %v2023_v55 = vmax.f32 %v1986_v53, 0.0 }
 0x39a   :  { %v2147_v18 = vpop.f32.mrf.mxu0 }
 0x39b   :  { %v2148_v22 = vadd.f32 %v5156_v17, %v2147_v18 }
 0x39d   :  { %v2211_v58 = vmax.f32 %v2148_v22, 0.0 }
 0x39e   :  { %v1987_v51 = vpop.f32.mrf.mxu3 }
 0x39f   :  { %v2237_v63 = vpack.c.bf16 %v2211_v58, %v2210_v46  ;;  %v1988_v42 = vadd.f32 %v5106_v19, %v1987_v51 }
 0x3a1   :  { %v2024_v49 = vmax.f32 %v1988_v42, 0.0  ;;  %2349 = vmatmul.bf16.gmra.mxu1 %v2237_v63 }
 0x3a2   :  { %v2150_v62 = vpop.f32.mrf.mxu0 }
 0x3a3   :  { %v2041_v24 = vpack.c.bf16 %v2024_v49, %v2023_v55  ;;  %v2151_v47 = vadd.f32 %v5156_v17, %v2150_v62 }
 0x3a5   :  { %2189 = vmatmul.bf16.gmra.mxu0 %v2041_v24  ;;  %v2212_v23 = vmax.f32 %v2151_v47, 0.0 }
 0x3a6   :  { %v1990_v57 = vpop.f32.mrf.mxu3 }
 0x3a7   :  { %v1991_v45 = vadd.f32 %v5106_v19, %v1990_v57 }
 0x3a9   :  { %v2025_v52 = vmax.f32 %v1991_v45, 0.0 }
 0x3aa   :  { %v2152_v54 = vpop.f32.mrf.mxu0 }
 0x3ab   :  { %v2153_v10 = vadd.f32 %v5156_v17, %v2152_v54 }
 0x3ad   :  { %v2213_v39 = vmax.f32 %v2153_v10, 0.0 }
 0x3ae   :  { %v1992_v35 = vpop.f32.mrf.mxu3 }
 0x3af   :  { %v2238_v27 = vpack.c.bf16 %v2213_v39, %v2212_v23  ;;  %v1993_v26 = vadd.f32 %v5106_v19, %v1992_v35 }
 0x3b1   :  { %v2026_v1 = vmax.f32 %v1993_v26, 0.0  ;;  %2354 = vmatmul.bf16.gmra.mxu1 %v2238_v27 }
 0x3b2   :  { %v2155_v34 = vpop.f32.mrf.mxu0 }
 0x3b3   :  { %v2042_v13 = vpack.c.bf16 %v2026_v1, %v2025_v52  ;;  %v2156_v12 = vadd.f32 %v5156_v17, %v2155_v34 }
 0x3b5   :  { %2194 = vmatmul.bf16.gmra.mxu0 %v2042_v13  ;;  %v2214_v56 = vmax.f32 %v2156_v12, 0.0 }
 0x3ba   :  { %v2157_v16 = vpop.f32.mrf.mxu0 }
 0x3bb   :  { %v2158_v60 = vadd.f32 %v5156_v17, %v2157_v16 }
 0x3bd   :  { %v2215_v36 = vmax.f32 %v2158_v60, 0.0 }
 0x3bf   :  { %v2239_v0 = vpack.c.bf16 %v2215_v36, %v2214_v56 }
 0x3c1   :  { %2359 = vmatmul.bf16.gmra.mxu1 %v2239_v0 }
 0x3c2   :  { %v2160_v32 = vpop.f32.mrf.mxu0 }
 0x3c3   :  { %v2161_v61 = vadd.f32 %v5156_v17, %v2160_v32 }
 0x3c5   :  { %v2216_v59 = vmax.f32 %v2161_v61, 0.0 }
 0x3ca   :  { %v2162_v30 = vpop.f32.mrf.mxu0 }
 0x3cb   :  { %v2163_v19 = vadd.f32 %v5156_v17, %v2162_v30 }
 0x3cd   :  { %v2217_v2 = vmax.f32 %v2163_v19, 0.0 }
 0x3ce   :  { %v2325_v7 = vpop.f32.mrf.mxu1 }
 0x3cf   :  { %v2240_v3 = vpack.c.bf16 %v2217_v2, %v2216_v59  ;;  %v5196_v14 = vadd.f32 %v5193_v11, %v2325_v7 }
 0x3d1   :  { %2364 = vmatmul.bf16.gmra.mxu1 %v2240_v3  ;;  %2405 = vmax.xlane.f32.xlu0 %v5196_v14 }
 0x3d2   :  { %v2165_v33 = vpop.f32.mrf.mxu0 }
 0x3d3   :  { %v2166_v15 = vadd.f32 %v5156_v17, %v2165_v33 }
 0x3d5   :  { %v2218_v41 = vmax.f32 %v2166_v15, 0.0 }
 0x3d6   :  { %v2327_v20 = vpop.f32.mrf.mxu1 }
 0x3d7   :  { %v5200_v44 = vadd.f32 %v5193_v11, %v2327_v20 }
 0x3d9   :  { %2407 = vmax.xlane.f32.xlu0 %v5200_v44 }
 0x3da   :  { %v2167_v31 = vpop.f32.mrf.mxu0 }
 0x3db   :  { %v2168_v6 = vadd.f32 %v5156_v17, %v2167_v31 }
 0x3dd   :  { %v2219_v37 = vmax.f32 %v2168_v6, 0.0 }
 0x3de   :  { %v2330_v48 = vpop.f32.mrf.mxu1 }
 0x3df   :  { %v2241_v40 = vpack.c.bf16 %v2219_v37, %v2218_v41  ;;  %v5206_v21 = vadd.f32 %v5193_v11, %v2330_v48 }
 0x3e1   :  { %2369 = vmatmul.bf16.gmra.mxu1 %v2241_v40  ;;  %2409 = vmax.xlane.f32.xlu1 %v5206_v21 }
 0x3e2   :  { %v2170_v28 = vpop.f32.mrf.mxu0 }
 0x3e3   :  { %v2171_v25 = vadd.f32 %v5156_v17, %v2170_v28 }
 0x3e5   :  { %v2220_v8 = vmax.f32 %v2171_v25, 0.0 }
 0x3e6   :  { %v2332_v5 = vpop.f32.mrf.mxu1 }
 0x3e7   :  { %v5210_v9 = vadd.f32 %v5193_v11, %v2332_v5 }
 0x3e9   :  { %2411 = vmax.xlane.f32.xlu1 %v5210_v9 }
 0x3ea   :  { %v2172_v4 = vpop.f32.mrf.mxu0 }
 0x3eb   :  { %v2173_v43 = vadd.f32 %v5156_v17, %v2172_v4 }
 0x3ed   :  { %v2221_v38 = vmax.f32 %v2173_v43, 0.0 }
 0x3ee   :  { %v2335_v50 = vpop.f32.mrf.mxu1 }
 0x3ef   :  { %v2242_v29 = vpack.c.bf16 %v2221_v38, %v2220_v8  ;;  %v5216_v18 = vadd.f32 %v5193_v11, %v2335_v50 }
 0x3f1   :  { %2374 = vmatmul.bf16.gmra.mxu1 %v2242_v29  ;;  %2413 = vmax.xlane.f32.xlu2 %v5216_v18 }
 0x3f2   :  { %v2175_v22 = vpop.f32.mrf.mxu0 }
 0x3f3   :  { %v2176_v58 = vadd.f32 %v5156_v17, %v2175_v22 }
 0x3f5   :  { %v2222_v42 = vmax.f32 %v2176_v58, 0.0 }
 0x3f6   :  { %v2337_v46 = vpop.f32.mrf.mxu1 }
 0x3f7   :  { %v5220_v53 = vadd.f32 %v5193_v11, %v2337_v46 }
 0x3f9   :  { %2415 = vmax.xlane.f32.xlu2 %v5220_v53 }
 0x3fa   :  { %v2177_v51 = vpop.f32.mrf.mxu0 }
 0x3fb   :  { %v2178_v63 = vadd.f32 %v5156_v17, %v2177_v51 }
 0x3fd   :  { %v2223_v55 = vmax.f32 %v2178_v63, 0.0 }
 0x3fe   :  { %v2340_v49 = vpop.f32.mrf.mxu1 }
 0x3ff   :  { %v2243_v62 = vpack.c.bf16 %v2223_v55, %v2222_v42  ;;  %v5226_v24 = vadd.f32 %v5193_v11, %v2340_v49 }
 0x401   :  { %2379 = vmatmul.bf16.gmra.mxu1 %v2243_v62  ;;  %2417 = vmax.xlane.f32.xlu0 %v5226_v24 }
 0x402   :  { %v2180_v57 = vpop.f32.mrf.mxu0 }
 0x403   :  { %v2181_v10 = vadd.f32 %v5156_v17, %v2180_v57 }
 0x405   :  { %v2224_v39 = vmax.f32 %v2181_v10, 0.0 }
 0x406   :  { %v2342_v47 = vpop.f32.mrf.mxu1 }
 0x407   :  { %v5230_v54 = vadd.f32 %v5193_v11, %v2342_v47 }
 0x409   :  { %2419 = vmax.xlane.f32.xlu1 %v5230_v54 }
 0x40a   :  { %v2182_v23 = vpop.f32.mrf.mxu0 }
 0x40b   :  { %v2183_v45 = vadd.f32 %v5156_v17, %v2182_v23 }
 0x40d   :  { %v2225_v35 = vmax.f32 %v2183_v45, 0.0 }
 0x40e   :  { %v2345_v27 = vpop.f32.mrf.mxu1 }
 0x40f   :  { %v2244_v26 = vpack.c.bf16 %v2225_v35, %v2224_v39  ;;  %v5236_v52 = vadd.f32 %v5193_v11, %v2345_v27 }
 0x411   :  { %2384 = vmatmul.bf16.gmra.mxu1 %v2244_v26  ;;  %2421 = vmax.xlane.f32.xlu2 %v5236_v52 }
 0x412   :  { %v2185_v1 = vpop.f32.mrf.mxu0 }
 0x413   :  { %v2186_v12 = vadd.f32 %v5156_v17, %v2185_v1 }
 0x415   :  { %v2226_v56 = vmax.f32 %v2186_v12, 0.0 }
 0x416   :  { %v2347_v34 = vpop.f32.mrf.mxu1 }
 0x417   :  { %v5240_v13 = vadd.f32 %v5193_v11, %v2347_v34 }
 0x419   :  { %2423 = vmax.xlane.f32.xlu0 %v5240_v13 }
 0x41a   :  { %v2187_v16 = vpop.f32.mrf.mxu0 }
 0x41b   :  { %v2188_v60 = vadd.f32 %v5156_v17, %v2187_v16 }
 0x41d   :  { %v2227_v36 = vmax.f32 %v2188_v60, 0.0 }
 0x41e   :  { %v2350_v0 = vpop.f32.mrf.mxu1 }
 0x41f   :  { %v2245_v32 = vpack.c.bf16 %v2227_v36, %v2226_v56  ;;  %v5246_v61 = vadd.f32 %v5193_v11, %v2350_v0 }
 0x421   :  { %2389 = vmatmul.bf16.gmra.mxu1 %v2245_v32  ;;  %2425 = vmax.xlane.f32.xlu1 %v5246_v61 }
 0x422   :  { %v2190_v30 = vpop.f32.mrf.mxu0 }
 0x423   :  { %v2191_v2 = vadd.f32 %v5156_v17, %v2190_v30 }
 0x425   :  { %v2228_v33 = vmax.f32 %v2191_v2, 0.0 }
 0x426   :  { %v2352_v19 = vpop.f32.mrf.mxu1 }
 0x427   :  { %v5250_v59 = vadd.f32 %v5193_v11, %v2352_v19 }
 0x429   :  { %2427 = vmax.xlane.f32.xlu2 %v5250_v59 }
 0x42a   :  { %v2192_v7 = vpop.f32.mrf.mxu0 }
 0x42b   :  { %v2193_v3 = vadd.f32 %v5156_v17, %v2192_v7 }
 0x42d   :  { %v2229_v20 = vmax.f32 %v2193_v3, 0.0 }
 0x42e   :  { %v2355_v15 = vpop.f32.mrf.mxu1 }
 0x42f   :  { %v2246_v31 = vpack.c.bf16 %v2229_v20, %v2228_v33  ;;  %v5256_v6 = vadd.f32 %v5193_v11, %v2355_v15 }
 0x431   :  { %2394 = vmatmul.bf16.gmra.mxu1 %v2246_v31  ;;  %2429 = vmax.xlane.f32.xlu0 %v5256_v6 }
 0x432   :  { %v2195_v41 = vpop.f32.mrf.mxu0 }
 0x433   :  { %v2196_v40 = vadd.f32 %v5156_v17, %v2195_v41 }
 0x435   :  { %v2230_v25 = vmax.f32 %v2196_v40, 0.0 }
 0x436   :  { %v2357_v37 = vpop.f32.mrf.mxu1 }
 0x437   :  { %v5260_v48 = vadd.f32 %v5193_v11, %v2357_v37 }
 0x439   :  { %2431 = vmax.xlane.f32.xlu1 %v5260_v48 }
 0x43a   :  { %v2197_v28 = vpop.f32.mrf.mxu0 }
 0x43b   :  { %v2198_v5 = vadd.f32 %v5156_v17, %v2197_v28 }
 0x43d   :  { %v2231_v4 = vmax.f32 %v2198_v5, 0.0 }
 0x43e   :  { %v2360_v43 = vpop.f32.mrf.mxu1 }
 0x43f   :  { %v2247_v8 = vpack.c.bf16 %v2231_v4, %v2230_v25  ;;  %v5266_v38 = vadd.f32 %v5193_v11, %v2360_v43 }
 0x441   :  { %2399 = vmatmul.bf16.gmra.mxu1 %v2247_v8  ;;  %2433 = vmax.xlane.f32.xlu2 %v5266_v38 }
 0x444   :  { %v2406_v50 = vpop.xlane.xlu0 %2405 }
 0x445   :  { %v5270_v29 = vsub.f32 %v5196_v14, %v2406_v50 }
 0x446   :  { %v2362_v22 = vpop.f32.mrf.mxu1 }
 0x447   :  { %v2501_v46 = vmul.f32 1.442695, %v5270_v29  ;;  %v5274_v58 = vadd.f32 %v5193_v11, %v2362_v22 }
 0x449   :  { %3739 = vpow2.f32 %v2501_v46  ;;  %2435 = vmax.xlane.f32.xlu0 %v5274_v58 }
 0x44c   :  { %v2408_v17 = vpop.xlane.xlu0 %2407 }
 0x44d   :  { %v5278_v51 = vsub.f32 %v5200_v44, %v2408_v17 }
 0x44e   :  { %v2365_v63 = vpop.f32.mrf.mxu1 }
 0x44f   :  { %v3740_v42 = vpop.eup %3739  ;;  %v2503_v55 = vmul.f32 1.442695, %v5278_v51  ;;  %v5282_v14 = vadd.f32 %v5193_v11, %v2365_v63 }
 0x450   :  { %2565 = vadd.xlane.f32.xlu2 %v3740_v42 }
 0x451   :  { %3741 = vpow2.f32 %v2503_v55  ;;  %2437 = vmax.xlane.f32.xlu1 %v5282_v14 }
 0x454   :  { %v2410_v49 = vpop.xlane.xlu1 %2409 }
 0x455   :  { %v5286_v62 = vsub.f32 %v5206_v21, %v2410_v49 }
 0x456   :  { %v2367_v57 = vpop.f32.mrf.mxu1 }
 0x457   :  { %v3742_v47 = vpop.eup %3741  ;;  %v2505_v44 = vmul.f32 1.442695, %v5286_v62  ;;  %v5290_v10 = vadd.f32 %v5193_v11, %v2367_v57 }
 0x458   :  { %2567 = vadd.xlane.f32.xlu0 %v3742_v47 }
 0x459   :  { %3743 = vpow2.f32 %v2505_v44  ;;  %2439 = vmax.xlane.f32.xlu2 %v5290_v10 }
 0x45c   :  { %v2412_v23 = vpop.xlane.xlu1 %2411 }
 0x45d   :  { %v5294_v45 = vsub.f32 %v5210_v9, %v2412_v23 }
 0x45e   :  { %v2370_v39 = vpop.f32.mrf.mxu1 }
 0x45f   :  { %v3744_v35 = vpop.eup %3743  ;;  %v2507_v21 = vmul.f32 1.442695, %v5294_v45  ;;  %v5298_v27 = vadd.f32 %v5193_v11, %v2370_v39 }
 0x460   :  { %2569 = vadd.xlane.f32.xlu1 %v3744_v35 }
 0x461   :  { %3745 = vpow2.f32 %v2507_v21  ;;  %2441 = vmax.xlane.f32.xlu0 %v5298_v27 }
 0x464   :  { %v2414_v26 = vpop.xlane.xlu2 %2413 }
 0x465   :  { %v5302_v1 = vsub.f32 %v5216_v18, %v2414_v26 }
 0x466   :  { %v2372_v34 = vpop.f32.mrf.mxu1 }
 0x467   :  { %v3746_v12 = vpop.eup %3745  ;;  %v2509_v9 = vmul.f32 1.442695, %v5302_v1  ;;  %v5306_v16 = vadd.f32 %v5193_v11, %v2372_v34 }
 0x468   :  { %2571 = vadd.xlane.f32.xlu2 %v3746_v12 }
 0x469   :  { %3747 = vpow2.f32 %v2509_v9  ;;  %2443 = vmax.xlane.f32.xlu1 %v5306_v16 }
 0x46c   :  { %v2416_v60 = vpop.xlane.xlu2 %2415 }
 0x46d   :  { %v5310_v56 = vsub.f32 %v5220_v53, %v2416_v60 }
 0x46e   :  { %v2375_v36 = vpop.f32.mrf.mxu1 }
 0x46f   :  { %v3748_v0 = vpop.eup %3747  ;;  %v2511_v18 = vmul.f32 1.442695, %v5310_v56  ;;  %v5314_v32 = vadd.f32 %v5193_v11, %v2375_v36 }
 0x470   :  { %2573 = vadd.xlane.f32.xlu0 %v3748_v0 }
 0x471   :  { %3749 = vpow2.f32 %v2511_v18  ;;  %2445 = vmax.xlane.f32.xlu2 %v5314_v32 }
 0x474   :  { %v2418_v30 = vpop.xlane.xlu0 %2417 }
 0x475   :  { %v5318_v19 = vsub.f32 %v5226_v24, %v2418_v30 }
 0x476   :  { %v2377_v2 = vpop.f32.mrf.mxu1 }
 0x477   :  { %v3750_v7 = vpop.eup %3749  ;;  %v2513_v53 = vmul.f32 1.442695, %v5318_v19  ;;  %v5322_v3 = vadd.f32 %v5193_v11, %v2377_v2 }
 0x478   :  { %2575 = vadd.xlane.f32.xlu1 %v3750_v7 }
 0x479   :  { %3751 = vpow2.f32 %v2513_v53  ;;  %2447 = vmax.xlane.f32.xlu0 %v5322_v3 }
 0x47c   :  { %v2420_v33 = vpop.xlane.xlu1 %2419 }
 0x47d   :  { %v5326_v20 = vsub.f32 %v5230_v54, %v2420_v33 }
 0x47e   :  { %v2380_v15 = vpop.f32.mrf.mxu1 }
 0x47f   :  { %v3752_v31 = vpop.eup %3751  ;;  %v2515_v24 = vmul.f32 1.442695, %v5326_v20  ;;  %v5330_v41 = vadd.f32 %v5193_v11, %v2380_v15 }
 0x480   :  { %2577 = vadd.xlane.f32.xlu2 %v3752_v31 }
 0x481   :  { %3753 = vpow2.f32 %v2515_v24  ;;  %2449 = vmax.xlane.f32.xlu1 %v5330_v41 }
 0x484   :  { %v2422_v37 = vpop.xlane.xlu2 %2421 }
 0x485   :  { %v5334_v40 = vsub.f32 %v5236_v52, %v2422_v37 }
 0x486   :  { %v2382_v28 = vpop.f32.mrf.mxu1 }
 0x487   :  { %v3754_v5 = vpop.eup %3753  ;;  %v2517_v54 = vmul.f32 1.442695, %v5334_v40  ;;  %v5338_v25 = vadd.f32 %v5193_v11, %v2382_v28 }
 0x488   :  { %2579 = vadd.xlane.f32.xlu0 %v3754_v5 }
 0x489   :  { %3755 = vpow2.f32 %v2517_v54  ;;  %2451 = vmax.xlane.f32.xlu2 %v5338_v25 }
 0x48c   :  { %v2424_v4 = vpop.xlane.xlu0 %2423 }
 0x48d   :  { %v5342_v43 = vsub.f32 %v5240_v13, %v2424_v4 }
 0x48e   :  { %v2385_v8 = vpop.f32.mrf.mxu1 }
 0x48f   :  { %v3756_v50 = vpop.eup %3755  ;;  %v2519_v52 = vmul.f32 1.442695, %v5342_v43  ;;  %v5346_v22 = vadd.f32 %v5193_v11, %v2385_v8 }
 0x490   :  { %2581 = vadd.xlane.f32.xlu1 %v3756_v50 }
 0x491   :  { %3757 = vpow2.f32 %v2519_v52  ;;  %2453 = vmax.xlane.f32.xlu0 %v5346_v22 }
 0x494   :  { %v2426_v46 = vpop.xlane.xlu1 %2425 }
 0x495   :  { %v5350_v17 = vsub.f32 %v5246_v61, %v2426_v46 }
 0x496   :  { %v2387_v63 = vpop.f32.mrf.mxu1 }
 0x497   :  { %v3758_v42 = vpop.eup %3757  ;;  %v2521_v13 = vmul.f32 1.442695, %v5350_v17  ;;  %v5354_v55 = vadd.f32 %v5193_v11, %v2387_v63 }
 0x498   :  { %2583 = vadd.xlane.f32.xlu2 %v3758_v42 }
 0x499   :  { %3759 = vpow2.f32 %v2521_v13  ;;  %2455 = vmax.xlane.f32.xlu1 %v5354_v55 }
 0x49c   :  { %v2428_v26 = vpop.xlane.xlu2 %2427 }
 0x49e   :  { %v2390_v49 = vpop.f32.mrf.mxu1 }
 0x49f   :  { %v3760_v57 = vpop.eup %3759  ;;  %v5358_v47 = vadd.f32 %v5193_v11, %v2390_v49 }
 0x4a0   :  { %2585 = vadd.xlane.f32.xlu0 %v3760_v57 }
 0x4a1   :  { %2457 = vmax.xlane.f32.xlu2 %v5358_v47 }
 0x4a4   :  { %v2430_v39 = vpop.xlane.xlu0 %2429 }
 0x4a5   :  { %v5370_v21 = vsub.f32 %v5256_v6, %v2430_v39 }
 0x4a6   :  { %v2392_v61 = vpop.f32.mrf.mxu1 }
 0x4a7   :  { %v5362_v44 = vadd.f32 %v5193_v11, %v2392_v61  ;;  %v2525_v34 = vmul.f32 1.442695, %v5370_v21 }
 0x4a9   :  { %2459 = vmax.xlane.f32.xlu0 %v5362_v44  ;;  %3761 = vpow2.f32 %v2525_v34 }
 0x4ac   :  { %v2432_v9 = vpop.xlane.xlu1 %2431 }
 0x4ad   :  { %v5378_v36 = vsub.f32 %v5260_v48, %v2432_v9  ;;  %v5390_v48 = vsub.f32 %v5250_v59, %v2428_v26 }
 0x4ae   :  { %v2395_v23 = vpop.f32.mrf.mxu1 }
 0x4af   :  { %v5366_v35 = vadd.f32 %v5193_v11, %v2395_v23  ;;  %v2527_v6 = vmul.f32 1.442695, %v5378_v36  ;;  %v3762_v33 = vpop.eup %3761  ;;  %v2523_v24 = vmul.f32 1.442695, %v5390_v48 }
 0x4b1   :  { %2461 = vmax.xlane.f32.xlu1 %v5366_v35 }
 0x4b4   :  { %v2434_v0 = vpop.xlane.xlu2 %2433 }
 0x4b5   :  { %v5402_v8 = vsub.f32 %v5266_v38, %v2434_v0 }
 0x4b6   :  { %v2397_v12 = vpop.f32.mrf.mxu1 }
 0x4b7   :  { %v5374_v60 = vadd.f32 %v5193_v11, %v2397_v12  ;;  %v2529_v46 = vmul.f32 1.442695, %v5402_v8 }
 0x4b9   :  { %2463 = vmax.xlane.f32.xlu2 %v5374_v60 }
 0x4bc   :  { %v2436_v18 = vpop.xlane.xlu0 %2435 }
 0x4bd   :  { %v5381_v30 = vsub.f32 %v5274_v58, %v2436_v18 }
 0x4be   :  { %v2400_v2 = vpop.f32.mrf.mxu1 }
 0x4bf   :  { %v2531_v7 = vmul.f32 1.442695, %v5381_v30  ;;  %v5386_v53 = vadd.f32 %v5193_v11, %v2400_v2 }
 0x4c1   :  { %3763 = vpow2.f32 %v2531_v7  ;;  %2465 = vmax.xlane.f32.xlu0 %v5386_v53  ;;  %2589 = vadd.xlane.f32.xlu2 %v3762_v33 }
 0x4c2   :  { %3765 = vpow2.f32 %v2527_v6 }
 0x4c3   :  { %v2566_v15 = vpop.xlane.xlu2 %2565 }
 0x4c4   :  { %3767 = vlog2.f32 %v2566_v15  ;;  %v2438_v58 = vpop.xlane.xlu1 %2437 }
 0x4c5   :  { %v5393_v31 = vsub.f32 %v5282_v14, %v2438_v58 }
 0x4c6   :  { %v2402_v37 = vpop.f32.mrf.mxu1 }
 0x4c7   :  { %v3764_v28 = vpop.eup %3763  ;;  %v2533_v5 = vmul.f32 1.442695, %v5393_v31  ;;  %v5398_v54 = vadd.f32 %v5193_v11, %v2402_v37 }
 0x4c8   :  { %v3766_v4 = vpop.eup %3765 }
 0x4c9   :  { %3769 = vpow2.f32 %v2533_v5  ;;  %2467 = vmax.xlane.f32.xlu1 %v5398_v54  ;;  %2591 = vadd.xlane.f32.xlu0 %v3766_v4 }
 0x4ca   :  { %v3768_v59 = vpop.eup %3767  ;;  %3771 = vpow2.f32 %v2523_v24  ;;  %2595 = vadd.xlane.f32.xlu2 %v3764_v28 }
 0x4cb   :  { %v2630_v14 = vmul.f32 0.6931472, %v3768_v59  ;;  %v2568_v50 = vpop.xlane.xlu0 %2567 }
 0x4cc   :  { %3773 = vlog2.f32 %v2568_v50  ;;  %v2440_v63 = vpop.xlane.xlu2 %2439 }
 0x4cd   :  { %v2693_v52 = vsub.f32 %v5270_v29, %v2630_v14  ;;  %3775 = vpow2.f32 %v2529_v46  ;;  %v5407_v49 = vsub.f32 %v5290_v10, %v2440_v63 }
 0x4cf   :  { %v3770_v11 = vpop.eup %3769  ;;  %2725 = vst [vmem:[#allocation2] sm:$0xff] %v2693_v52  ;;  %v2535_v39 = vmul.f32 1.442695, %v5407_v49 }
 0x4d0   :  { %v3772_v42 = vpop.eup %3771 }
 0x4d1   :  { %2587 = vadd.xlane.f32.xlu1 %v3772_v42  ;;  %2597 = vadd.xlane.f32.xlu0 %v3770_v11 }
 0x4d2   :  { %v3774_v13 = vpop.eup %3773 }
 0x4d3   :  { %v2632_v38 = vmul.f32 0.6931472, %v3774_v13  ;;  %v2570_v57 = vpop.xlane.xlu1 %2569  ;;  %v3776_v34 = vpop.eup %3775 }
 0x4d4   :  { %3777 = vlog2.f32 %v2570_v57  ;;  %v2442_v61 = vpop.xlane.xlu0 %2441 }
 0x4d5   :  { %v2694_v23 = vsub.f32 %v5278_v51, %v2632_v38  ;;  %v5411_v29 = vsub.f32 %v5298_v27, %v2442_v61 }
 0x4d7   :  { %2726 = vst [vmem:[#allocation2 + $0x8] sm:$0xff] %v2694_v23  ;;  %v2537_v26 = vmul.f32 1.442695, %v5411_v29 }
 0x4d9   :  { %3779 = vpow2.f32 %v2537_v26  ;;  %2593 = vadd.xlane.f32.xlu1 %v3776_v34 }
 0x4da   :  { %v3778_v12 = vpop.eup %3777  ;;  %3781 = vpow2.f32 %v2535_v39 }
 0x4db   :  { %v2634_v10 = vmul.f32 0.6931472, %v3778_v12  ;;  %v2572_v9 = vpop.xlane.xlu2 %2571 }
 0x4dc   :  { %3783 = vlog2.f32 %v2572_v9  ;;  %v2444_v0 = vpop.xlane.xlu1 %2443 }
 0x4dd   :  { %v2695_v18 = vsub.f32 %v5286_v62, %v2634_v10  ;;  %v5417_v51 = vsub.f32 %v5306_v16, %v2444_v0 }
 0x4df   :  { %v3780_v27 = vpop.eup %3779  ;;  %2727 = vst [vmem:[#allocation2 + $0x10] sm:$0xff] %v2695_v18  ;;  %v2539_v6 = vmul.f32 1.442695, %v5417_v51 }
 0x4e0   :  { %v3782_v2 = vpop.eup %3781  ;;  %2601 = vadd.xlane.f32.xlu2 %v3780_v27 }
 0x4e1   :  { %3785 = vpow2.f32 %v2539_v6  ;;  %2599 = vadd.xlane.f32.xlu1 %v3782_v2 }
 0x4e2   :  { %v3784_v7 = vpop.eup %3783 }
 0x4e3   :  { %v2636_v33 = vmul.f32 0.6931472, %v3784_v7  ;;  %v2574_v15 = vpop.xlane.xlu0 %2573 }
 0x4e4   :  { %3787 = vlog2.f32 %v2574_v15  ;;  %v2446_v58 = vpop.xlane.xlu2 %2445 }
 0x4e5   :  { %v2696_v24 = vsub.f32 %v5294_v45, %v2636_v33  ;;  %v5422_v62 = vsub.f32 %v5314_v32, %v2446_v58 }
 0x4e7   :  { %v3786_v16 = vpop.eup %3785  ;;  %2728 = vst [vmem:[#allocation2 + $0x18] sm:$0xff] %v2696_v24  ;;  %v2541_v37 = vmul.f32 1.442695, %v5422_v62 }
 0x4e8   :  { %2603 = vadd.xlane.f32.xlu0 %v3786_v16 }
 0x4e9   :  { %3789 = vpow2.f32 %v2541_v37 }
 0x4ea   :  { %v3788_v28 = vpop.eup %3787 }
 0x4eb   :  { %v2638_v5 = vmul.f32 0.6931472, %v3788_v28  ;;  %v2576_v4 = vpop.xlane.xlu1 %2575 }
 0x4ec   :  { %3791 = vlog2.f32 %v2576_v4  ;;  %v2448_v59 = vpop.xlane.xlu0 %2447 }
 0x4ed   :  { %v2697_v14 = vsub.f32 %v5302_v1, %v2638_v5  ;;  %v5427_v50 = vsub.f32 %v5322_v3, %v2448_v59 }
 0x4ef   :  { %v3790_v45 = vpop.eup %3789  ;;  %2729 = vst [vmem:[#allocation2 + $0x20] sm:$0xff] %v2697_v14  ;;  %v2543_v32 = vmul.f32 1.442695, %v5427_v50 }
 0x4f0   :  { %2605 = vadd.xlane.f32.xlu1 %v3790_v45 }
 0x4f1   :  { %3793 = vpow2.f32 %v2543_v32 }
 0x4f2   :  { %v3792_v52 = vpop.eup %3791 }
 0x4f3   :  { %v2640_v46 = vmul.f32 0.6931472, %v3792_v52  ;;  %v2578_v11 = vpop.xlane.xlu2 %2577 }
 0x4f4   :  { %3795 = vlog2.f32 %v2578_v11  ;;  %v2450_v63 = vpop.xlane.xlu1 %2449 }
 0x4f5   :  { %v2698_v42 = vsub.f32 %v5310_v56, %v2640_v46  ;;  %v5432_v13 = vsub.f32 %v5330_v41, %v2450_v63 }
 0x4f7   :  { %v3794_v1 = vpop.eup %3793  ;;  %2730 = vst [vmem:[#allocation2 + $0x28] sm:$0xff] %v2698_v42  ;;  %v2545_v3 = vmul.f32 1.442695, %v5432_v13 }
 0x4f8   :  { %2607 = vadd.xlane.f32.xlu2 %v3794_v1 }
 0x4f9   :  { %3797 = vpow2.f32 %v2545_v3 }
 0x4fa   :  { %v3796_v38 = vpop.eup %3795 }
 0x4fb   :  { %v2642_v57 = vmul.f32 0.6931472, %v3796_v38  ;;  %v2580_v61 = vpop.xlane.xlu0 %2579 }
 0x4fc   :  { %3799 = vlog2.f32 %v2580_v61  ;;  %v2452_v23 = vpop.xlane.xlu2 %2451 }
 0x4fd   :  { %v2699_v39 = vsub.f32 %v5318_v19, %v2642_v57  ;;  %v5437_v26 = vsub.f32 %v5338_v25, %v2452_v23 }
 0x4ff   :  { %v3798_v56 = vpop.eup %3797  ;;  %2731 = vst [vmem:[#allocation2 + $0x30] sm:$0xff] %v2699_v39  ;;  %v2547_v41 = vmul.f32 1.442695, %v5437_v26 }
 0x500   :  { %2609 = vadd.xlane.f32.xlu0 %v3798_v56 }
 0x501   :  { %3801 = vpow2.f32 %v2547_v41 }
 0x502   :  { %v3800_v34 = vpop.eup %3799 }
 0x503   :  { %v2644_v12 = vmul.f32 0.6931472, %v3800_v34  ;;  %v2582_v10 = vpop.xlane.xlu1 %2581 }
 0x504   :  { %3803 = vlog2.f32 %v2582_v10  ;;  %v2454_v9 = vpop.xlane.xlu0 %2453 }
 0x505   :  { %v2700_v0 = vsub.f32 %v5326_v20, %v2644_v12  ;;  %v5442_v18 = vsub.f32 %v5346_v22, %v2454_v9 }
 0x507   :  { %v3802_v19 = vpop.eup %3801  ;;  %2732 = vst [vmem:[#allocation2 + $0x38] sm:$0xff] %v2700_v0  ;;  %v2549_v25 = vmul.f32 1.442695, %v5442_v18 }
 0x508   :  { %2611 = vadd.xlane.f32.xlu1 %v3802_v19 }
 0x509   :  { %3805 = vpow2.f32 %v2549_v25 }
 0x50a   :  { %v3804_v27 = vpop.eup %3803 }
 0x50b   :  { %v2646_v6 = vmul.f32 0.6931472, %v3804_v27  ;;  %v2584_v2 = vpop.xlane.xlu2 %2583 }
 0x50c   :  { %3807 = vlog2.f32 %v2584_v2  ;;  %v2456_v7 = vpop.xlane.xlu1 %2455 }
 0x50d   :  { %v2701_v33 = vsub.f32 %v5334_v40, %v2646_v6  ;;  %v5447_v15 = vsub.f32 %v5354_v55, %v2456_v7 }
 0x50f   :  { %v3806_v20 = vpop.eup %3805  ;;  %2733 = vst [vmem:[#allocation2 + $0x40] sm:$0xff] %v2701_v33  ;;  %v2551_v22 = vmul.f32 1.442695, %v5447_v15 }
 0x510   :  { %2613 = vadd.xlane.f32.xlu2 %v3806_v20 }
 0x511   :  { %3809 = vpow2.f32 %v2551_v22 }
 0x512   :  { %v3808_v58 = vpop.eup %3807 }
 0x513   :  { %v2648_v24 = vmul.f32 0.6931472, %v3808_v58  ;;  %v2586_v16 = vpop.xlane.xlu0 %2585 }
 0x514   :  { %3811 = vlog2.f32 %v2586_v16  ;;  %v2458_v37 = vpop.xlane.xlu2 %2457 }
 0x515   :  { %v2702_v28 = vsub.f32 %v5342_v43, %v2648_v24  ;;  %v5452_v5 = vsub.f32 %v5358_v47, %v2458_v37 }
 0x517   :  { %v3810_v40 = vpop.eup %3809  ;;  %2734 = vst [vmem:[#allocation2 + $0x48] sm:$0xff] %v2702_v28  ;;  %v2553_v55 = vmul.f32 1.442695, %v5452_v5 }
 0x518   :  { %2615 = vadd.xlane.f32.xlu0 %v3810_v40 }
 0x519   :  { %3813 = vpow2.f32 %v2553_v55 }
 0x51a   :  { %v3812_v4 = vpop.eup %3811 }
 0x51b   :  { %v2650_v59 = vmul.f32 0.6931472, %v3812_v4 }
 0x51c   :  { %v2460_v14 = vpop.xlane.xlu0 %2459 }
 0x51d   :  { %v2703_v45 = vsub.f32 %v5350_v17, %v2650_v59  ;;  %v5457_v32 = vsub.f32 %v5362_v44, %v2460_v14 }
 0x51f   :  { %v3814_v52 = vpop.eup %3813  ;;  %2735 = vst [vmem:[#allocation2 + $0x50] sm:$0xff] %v2703_v45  ;;  %v2555_v43 = vmul.f32 1.442695, %v5457_v32 }
 0x520   :  { %2617 = vadd.xlane.f32.xlu1 %v3814_v52 }
 0x521   :  { %3815 = vpow2.f32 %v2555_v43 }
 0x524   :  { %v2462_v47 = vpop.xlane.xlu1 %2461 }
 0x525   :  { %v5461_v46 = vsub.f32 %v5366_v35, %v2462_v47 }
 0x527   :  { %v3816_v11 = vpop.eup %3815  ;;  %v2557_v63 = vmul.f32 1.442695, %v5461_v46 }
 0x528   :  { %2619 = vadd.xlane.f32.xlu2 %v3816_v11 }
 0x529   :  { %3817 = vpow2.f32 %v2557_v63 }
 0x52c   :  { %v2464_v42 = vpop.xlane.xlu2 %2463 }
 0x52d   :  { %v5465_v17 = vsub.f32 %v5374_v60, %v2464_v42 }
 0x52f   :  { %v3818_v44 = vpop.eup %3817  ;;  %v2559_v1 = vmul.f32 1.442695, %v5465_v17 }
 0x530   :  { %2621 = vadd.xlane.f32.xlu0 %v3818_v44 }
 0x531   :  { %3819 = vpow2.f32 %v2559_v1 }
 0x534   :  { %v2590_v3 = vpop.xlane.xlu2 %2589  ;;  %v2466_v38 = vpop.xlane.xlu0 %2465 }
 0x535   :  { %3821 = vlog2.f32 %v2590_v3  ;;  %v5469_v35 = vsub.f32 %v5386_v53, %v2466_v38 }
 0x537   :  { %v3820_v57 = vpop.eup %3819  ;;  %v2561_v61 = vmul.f32 1.442695, %v5469_v35 }
 0x538   :  { %2623 = vadd.xlane.f32.xlu1 %v3820_v57 }
 0x539   :  { %3823 = vpow2.f32 %v2561_v61 }
 0x53b   :  { %v3822_v23 = vpop.eup %3821 }
 0x53c   :  { %v2654_v39 = vmul.f32 0.6931472, %v3822_v23  ;;  %v2468_v60 = vpop.xlane.xlu1 %2467  ;;  %v2592_v56 = vpop.xlane.xlu0 %2591 }
 0x53d   :  { %v5473_v41 = vsub.f32 %v5398_v54, %v2468_v60  ;;  %v2596_v34 = vpop.xlane.xlu2 %2595  ;;  %3825 = vlog2.f32 %v2592_v56 }
 0x53e   :  { %v2705_v12 = vsub.f32 %v5370_v21, %v2654_v39  ;;  %3827 = vlog2.f32 %v2596_v34 }
 0x53f   :  { %v3824_v10 = vpop.eup %3823  ;;  %v2563_v53 = vmul.f32 1.442695, %v5473_v41 }
 0x540   :  { %2737 = vst [vmem:[#allocation2 + $0x60] sm:$0xff] %v2705_v12  ;;  %2625 = vadd.xlane.f32.xlu2 %v3824_v10 }
 0x541   :  { %3829 = vpow2.f32 %v2563_v53 }
 0x543   :  { %v3826_v9 = vpop.eup %3825 }
 0x544   :  { %v3828_v0 = vpop.eup %3827  ;;  %v2656_v19 = vmul.f32 0.6931472, %v3826_v9  ;;  %v2588_v25 = vpop.xlane.xlu1 %2587 }
 0x545   :  { %v2598_v27 = vpop.xlane.xlu0 %2597  ;;  %v2660_v6 = vmul.f32 0.6931472, %v3828_v0  ;;  %3831 = vlog2.f32 %v2588_v25 }
 0x546   :  { %v2706_v54 = vsub.f32 %v5378_v36, %v2656_v19  ;;  %3833 = vlog2.f32 %v2598_v27 }
 0x547   :  { %v3830_v2 = vpop.eup %3829  ;;  %v2708_v21 = vsub.f32 %v5381_v30, %v2660_v6 }
 0x548   :  { %2738 = vst [vmem:[#allocation2 + $0x68] sm:$0xff] %v2706_v54  ;;  %2627 = vadd.xlane.f32.xlu0 %v3830_v2 }
 0x549   :  { %2740 = vst [vmem:[#allocation2 + $0x78] sm:$0xff] %v2708_v21 }
 0x54b   :  { %v3832_v7 = vpop.eup %3831 }
 0x54c   :  { %v3834_v33 = vpop.eup %3833  ;;  %v2652_v20 = vmul.f32 0.6931472, %v3832_v7  ;;  %v2594_v22 = vpop.xlane.xlu1 %2593 }
 0x54d   :  { %v2662_v58 = vmul.f32 0.6931472, %v3834_v33  ;;  %3835 = vlog2.f32 %v2594_v22 }
 0x54e   :  { %v2704_v24 = vsub.f32 %v5390_v48, %v2652_v20 }
 0x54f   :  { %v2709_v16 = vsub.f32 %v5393_v31, %v2662_v58 }
 0x550   :  { %2736 = vst [vmem:[#allocation2 + $0x58] sm:$0xff] %v2704_v24 }
 0x551   :  { %2741 = vst [vmem:[#allocation2 + $0x80] sm:$0xff] %v2709_v16 }
 0x553   :  { %v3836_v36 = vpop.eup %3835  ;;  %v2602_v37 = vpop.xlane.xlu2 %2601 }
 0x554   :  { %v2658_v28 = vmul.f32 0.6931472, %v3836_v36  ;;  %3837 = vlog2.f32 %v2602_v37  ;;  %v2600_v30 = vpop.xlane.xlu1 %2599 }
 0x555   :  { %3839 = vlog2.f32 %v2600_v30 }
 0x556   :  { %v2707_v40 = vsub.f32 %v5402_v8, %v2658_v28 }
 0x558   :  { %2739 = vst [vmem:[#allocation2 + $0x70] sm:$0xff] %v2707_v40 }
 0x55a   :  { %v3838_v55 = vpop.eup %3837 }
 0x55b   :  { %v3840_v4 = vpop.eup %3839  ;;  %v2666_v59 = vmul.f32 0.6931472, %v3838_v55  ;;  %v2604_v14 = vpop.xlane.xlu0 %2603 }
 0x55c   :  { %v2664_v45 = vmul.f32 0.6931472, %v3840_v4  ;;  %3841 = vlog2.f32 %v2604_v14 }
 0x55d   :  { %v2711_v48 = vsub.f32 %v5411_v29, %v2666_v59 }
 0x55e   :  { %v2710_v31 = vsub.f32 %v5407_v49, %v2664_v45 }
 0x55f   :  { %2743 = vst [vmem:[#allocation2 + $0x90] sm:$0xff] %v2711_v48 }
 0x560   :  { %2742 = vst [vmem:[#allocation2 + $0x88] sm:$0xff] %v2710_v31 }
 0x562   :  { %v3842_v52 = vpop.eup %3841 }
 0x563   :  { %v2668_v43 = vmul.f32 0.6931472, %v3842_v52  ;;  %v2606_v47 = vpop.xlane.xlu1 %2605 }
 0x564   :  { %3843 = vlog2.f32 %v2606_v47 }
 0x565   :  { %v2712_v11 = vsub.f32 %v5417_v51, %v2668_v43 }
 0x567   :  { %2744 = vst [vmem:[#allocation2 + $0x98] sm:$0xff] %v2712_v11 }
 0x56a   :  { %v3844_v8 = vpop.eup %3843 }
 0x56b   :  { %v2670_v63 = vmul.f32 0.6931472, %v3844_v8  ;;  %v2608_v42 = vpop.xlane.xlu2 %2607 }
 0x56c   :  { %3845 = vlog2.f32 %v2608_v42 }
 0x56d   :  { %v2713_v44 = vsub.f32 %v5422_v62, %v2670_v63 }
 0x56f   :  { %2745 = vst [vmem:[#allocation2 + $0xa0] sm:$0xff] %v2713_v44 }
 0x572   :  { %v3846_v1 = vpop.eup %3845 }
 0x573   :  { %v2672_v29 = vmul.f32 0.6931472, %v3846_v1  ;;  %v2610_v3 = vpop.xlane.xlu0 %2609 }
 0x574   :  { %3847 = vlog2.f32 %v2610_v3 }
 0x575   :  { %v2714_v49 = vsub.f32 %v5427_v50, %v2672_v29 }
 0x577   :  { %2746 = vst [vmem:[#allocation2 + $0xa8] sm:$0xff] %v2714_v49 }
 0x57a   :  { %v3848_v38 = vpop.eup %3847 }
 0x57b   :  { %v2674_v57 = vmul.f32 0.6931472, %v3848_v38  ;;  %v2612_v61 = vpop.xlane.xlu1 %2611 }
 0x57c   :  { %3849 = vlog2.f32 %v2612_v61 }
 0x57d   :  { %v2715_v51 = vsub.f32 %v5432_v13, %v2674_v57 }
 0x57f   :  { %2747 = vst [vmem:[#allocation2 + $0xb0] sm:$0xff] %v2715_v51 }
 0x582   :  { %v3850_v23 = vpop.eup %3849 }
 0x583   :  { %v2676_v39 = vmul.f32 0.6931472, %v3850_v23  ;;  %v2614_v60 = vpop.xlane.xlu2 %2613 }
 0x584   :  { %3851 = vlog2.f32 %v2614_v60 }
 0x585   :  { %v2716_v62 = vsub.f32 %v5437_v26, %v2676_v39 }
 0x587   :  { %2748 = vst [vmem:[#allocation2 + $0xb8] sm:$0xff] %v2716_v62 }
 0x58a   :  { %v3852_v56 = vpop.eup %3851 }
 0x58b   :  { %v2678_v34 = vmul.f32 0.6931472, %v3852_v56  ;;  %v2616_v12 = vpop.xlane.xlu0 %2615 }
 0x58c   :  { %3853 = vlog2.f32 %v2616_v12 }
 0x58d   :  { %v2717_v50 = vsub.f32 %v5442_v18, %v2678_v34 }
 0x58f   :  { %2749 = vst [vmem:[#allocation2 + $0xc0] sm:$0xff] %v2717_v50 }
 0x592   :  { %v3854_v10 = vpop.eup %3853 }
 0x593   :  { %v2680_v53 = vmul.f32 0.6931472, %v3854_v10  ;;  %v2618_v9 = vpop.xlane.xlu1 %2617 }
 0x594   :  { %3855 = vlog2.f32 %v2618_v9 }
 0x595   :  { %v2718_v13 = vsub.f32 %v5447_v15, %v2680_v53 }
 0x597   :  { %2750 = vst [vmem:[#allocation2 + $0xc8] sm:$0xff] %v2718_v13 }
 0x59a   :  { %v3856_v0 = vpop.eup %3855 }
 0x59b   :  { %v2682_v19 = vmul.f32 0.6931472, %v3856_v0  ;;  %v2620_v25 = vpop.xlane.xlu2 %2619 }
 0x59c   :  { %3857 = vlog2.f32 %v2620_v25 }
 0x59d   :  { %v2719_v26 = vsub.f32 %v5452_v5, %v2682_v19 }
 0x59f   :  { %2751 = vst [vmem:[#allocation2 + $0xd0] sm:$0xff] %v2719_v26 }
 0x5a2   :  { %v3858_v27 = vpop.eup %3857 }
 0x5a3   :  { %v2684_v6 = vmul.f32 0.6931472, %v3858_v27  ;;  %v2622_v54 = vpop.xlane.xlu0 %2621 }
 0x5a4   :  { %3859 = vlog2.f32 %v2622_v54 }
 0x5a5   :  { %v2720_v18 = vsub.f32 %v5457_v32, %v2684_v6 }
 0x5a7   :  { %2752 = vst [vmem:[#allocation2 + $0xd8] sm:$0xff] %v2720_v18 }
 0x5aa   :  { %v3860_v2 = vpop.eup %3859 }
 0x5ab   :  { %v2686_v21 = vmul.f32 0.6931472, %v3860_v2  ;;  %v2624_v7 = vpop.xlane.xlu1 %2623 }
 0x5ac   :  { %3861 = vlog2.f32 %v2624_v7 }
 0x5ad   :  { %v2721_v15 = vsub.f32 %v5461_v46, %v2686_v21 }
 0x5af   :  { %2753 = vst [vmem:[#allocation2 + $0xe0] sm:$0xff] %v2721_v15 }
 0x5b2   :  { %v3862_v33 = vpop.eup %3861 }
 0x5b3   :  { %v2688_v20 = vmul.f32 0.6931472, %v3862_v33  ;;  %v2626_v22 = vpop.xlane.xlu2 %2625 }
 0x5b4   :  { %3863 = vlog2.f32 %v2626_v22 }
 0x5b5   :  { %v2722_v5 = vsub.f32 %v5465_v17, %v2688_v20 }
 0x5b7   :  { %2754 = vst [vmem:[#allocation2 + $0xe8] sm:$0xff] %v2722_v5 }
 0x5ba   :  { %v3864_v58 = vpop.eup %3863 }
 0x5bb   :  { %v2690_v24 = vmul.f32 0.6931472, %v3864_v58  ;;  %v2628_v16 = vpop.xlane.xlu0 %2627 }
 0x5bc   :  { %3865 = vlog2.f32 %v2628_v16 }
 0x5bd   :  { %v2723_v32 = vsub.f32 %v5469_v35, %v2690_v24 }
 0x5bf   :  { %2755 = vst [vmem:[#allocation2 + $0xf0] sm:$0xff] %v2723_v32 }
 0x5c2   :  { %v3866_v46 = vpop.eup %3865 }
 0x5c3   :  { %v2692_v36 = vmul.f32 0.6931472, %v3866_v46 }
 0x5c5   :  { %v2724_v17 = vsub.f32 %v5473_v41, %v2692_v36 }
 0x5c7   :  { %2756 = vst [vmem:[#allocation2 + $0xf8] sm:$0xff] %v2724_v17 }
 0x5c8   :  { %2769 = dma.vmem_to_hbm [thread:$0]  %s2762_s24, 4096, %s2764_s27, [#allocation3], %s3894_s28, %s3894_s28, %s3895_s29  }
 0x5c9   :  { %3891 = dma.done.wait [#allocation3], 4096  }
 0x5ca   :  { %3892 = vsyncadd [#allocation3], 4294963200 }
 0x5cb   :  { %2774 = vsyncpa [#allocation3], 1 }

</bundles_post_ra>
